<compile_context>
chip_gen: v5e
topology: v5e:2x2
jax: 0.10.0
libtpu: 0.0.40
codegen_flags: <defaults>
</compile_context>

<pallas_src>
import functools
import math

import numpy as np
import jax
import jax.numpy as jnp
from jax.experimental import pallas as pl
from jax.experimental.pallas import tpu as pltpu


def _layernorm(x, gamma, beta, eps=1e-6):
    # Matches Normalization(eps=1e-6): biased variance, eps inside rsqrt.
    mu = jnp.mean(x, axis=-1, keepdims=True)
    var = jnp.mean((x - mu) ** 2, axis=-1, keepdims=True)
    return (x - mu) * jax.lax.rsqrt(var + eps) * gamma + beta


def encoder_layer_kernel(
    src_ref,      # (Bt, S, E)
    ln_ref,       # (4, E)   rows: ln1_g, ln1_b, ln2_g, ln2_b
    wqkv_ref,     # (E, 3E)  fused Q|K|V projection (scale folded into Q part)
    bqkv_ref,     # (1, 3E)
    wo_ref,       # (E, E)
    bvec_ref,     # (2, E)   rows: bo, bf2
    w1_ref,       # (E, F)
    bf1_ref,      # (1, F)
    w2_ref,       # (F, E)
    out_ref,      # (Bt, S, E)
    *, n_head, compute_dtype,
):
    Bt, S, E = src_ref.shape
    H = n_head
    D = E // H
    M = Bt * S
    cd = compute_dtype

    x = src_ref[...].reshape(M, E)                      # flatten rows into matmul M dim

    ln = ln_ref[...]
    g1, b1, g2, b2 = ln[0:1], ln[1:2], ln[2:3], ln[3:4]
    bvec = bvec_ref[...]
    bo, bf2 = bvec[0:1], bvec[1:2]

    # --- normalization1 (f32) ---
    h = _layernorm(x, g1, b1)

    # --- fused QKV projection: one lane-dense (M,E)@(E,3E) bf16 matmul, f32 acc ---
    qkv = jnp.dot(h.astype(cd), wqkv_ref[...].astype(cd),
                  preferred_element_type=jnp.float32) + bqkv_ref[...]   # (M,3E) f32
    # Row-dim split only (no lane relayout); cast once so per-head slices move
    # half the bytes when cd=bf16.
    qkv3 = qkv.reshape(Bt, S, 3 * E).astype(cd)

    # --- multi-head self-attention ---
    # Batch stays as the einsum batch axis; heads are O(H) static lane slices.
    # Softmax (exp / reciprocal) stays f32 for accuracy and v5e compatibility;
    # MXU operands are cd with f32 accumulation. Scale already folded into wqkv.
    ctx_heads = []
    for hh in range(H):
        qh = qkv3[:, :, hh * D:(hh + 1) * D]
        kh = qkv3[:, :, E + hh * D: E + (hh + 1) * D]
        vh = qkv3[:, :, 2 * E + hh * D: 2 * E + (hh + 1) * D]

        s = jnp.einsum("bqd,bkd->bqk", qh, kh,
                       preferred_element_type=jnp.float32)          # (Bt,S,S) f32
        s = s - jnp.max(s, axis=-1, keepdims=True)
        p = jnp.exp(s)
        p = p * pl.reciprocal(jnp.sum(p, axis=-1, keepdims=True), approx=True)

        ctx_h = jnp.einsum("bqk,bkd->bqd", p.astype(cd), vh,
                           preferred_element_type=jnp.float32)      # (Bt,S,D) f32
        ctx_heads.append(ctx_h.astype(cd))                          # half concat bytes

    # Single H-way lane concatenate, then one big (M,E)@(E,E) out-projection.
    ctx = jnp.concatenate(ctx_heads, axis=-1).reshape(M, E)         # (M,E) cd

    attn = jnp.dot(ctx, wo_ref[...].astype(cd),
                   preferred_element_type=jnp.float32) + bo

    # --- first residual (f32) ---
    h1 = x + attn

    # --- normalization2 + feed-forward ---
    hn = _layernorm(h1, g2, b2)
    ff = jnp.dot(hn.astype(cd), w1_ref[...].astype(cd),
                 preferred_element_type=jnp.float32) + bf1_ref[...]
    ff = jnp.maximum(ff, 0.0)                                       # ReLU (f32)
    ff = jnp.dot(ff.astype(cd), w2_ref[...].astype(cd),
                 preferred_element_type=jnp.float32) + bf2

    out_ref[...] = (h1 + ff).reshape(Bt, S, E).astype(out_ref.dtype)


def _default_vmem_limit_bytes():
    phys = 64 * 1024 * 1024
    try:
        phys = int(pltpu.get_tpu_info().vmem_capacity_bytes)
    except Exception:
        pass
    # Headroom for Mosaic-internal scratch; never exceed physical (v7x: 64 MiB
    # per TensorCore), use up to ~100 MiB of v5e/v6e's 128 MiB.
    return max(32 * 1024 * 1024, min(phys - 16 * 1024 * 1024, 100 * 1024 * 1024))


def _block_vmem_bytes(Bt, S, E, F, cd_bytes):
    """Rough per-grid-step VMEM working set for a (Bt,S,E) block."""
    M = Bt * S
    io = 2 * (M * E * 4) * 2            # src + out tiles, double-buffered
    lnact = 4 * (M * E * 4)             # x / h / h1 / hn residencies (f32)
    qkv = M * 3 * E * (4 + cd_bytes)    # f32 matmul result + cd copy
    scores = 2 * 2 * (Bt * S * S * 4)   # s + p, ~2 heads live at a time (f32)
    ctx = M * E * cd_bytes
    ffn = M * F * (4 + cd_bytes)        # f32 FFN intermediate + cd relu copy
    return io + lnact + qkv + scores + ctx + ffn


def _pick_block_b(B, S, E, F, cd_bytes, weight_bytes, vmem_limit_bytes):
    # ~70% of the scoped limit for the per-step working set, after reserving
    # the resident weights (x2 in case Buffered(1) is unavailable).
    budget = int(vmem_limit_bytes * 0.7) - 2 * weight_bytes
    # Keep >= 2 grid steps so the "parallel" axis can shard across both v7x
    # TensorCores.
    max_bt = B // 2 if B >= 2 else 1
    best = 1
    for d in range(1, B + 1):
        if B % d == 0 and d <= max_bt and \
                _block_vmem_bytes(d, S, E, F, cd_bytes) <= budget:
            best = d
    return best


def encoder_layer(src, params, n_head, *, block_b=None,
                  compute_dtype=jnp.bfloat16, vmem_limit_bytes=None):
    """src: (B, S, E) float32 (batch_first). params: dict from init_params."""
    B, S, E = src.shape
    F = params["w1"].shape[1]
    assert E % n_head == 0
    cd_bytes = np.dtype(compute_dtype).itemsize

    weight_inputs = [
        params["ln_gb"], params["w_qkv"], params["b_qkv"], params["wo"],
        params["bo_bf2"], params["w1"], params["bf1"], params["w2"],
    ]
    weight_bytes = sum(int(w.size) * w.dtype.itemsize for w in weight_inputs)

    if vmem_limit_bytes is None:
        vmem_limit_bytes = _default_vmem_limit_bytes()
    if block_b is None:
        block_b = _pick_block_b(B, S, E, F, cd_bytes, weight_bytes,
                                vmem_limit_bytes)
    assert B % block_b == 0
    Bt = block_b

    kernel = functools.partial(encoder_layer_kernel, n_head=n_head,
                               compute_dtype=compute_dtype)

    def build(single_buffer_weights):
        wkw = ({"pipeline_mode": pl.Buffered(1)} if single_buffer_weights else {})
        # All weight inputs are 2-D with a constant index_map (resident blocks).
        weight_specs = [pl.BlockSpec(w.shape, lambda b: (0, 0), **wkw)
                        for w in weight_inputs]
        return pl.pallas_call(
            kernel,
            out_shape=jax.ShapeDtypeStruct((B, S, E), src.dtype),
            grid_spec=pltpu.PrefetchScalarGridSpec(
                num_scalar_prefetch=0,
                grid=(B // Bt,),
                in_specs=[pl.BlockSpec((Bt, S, E), lambda b: (b, 0, 0))]
                         + weight_specs,
                out_specs=pl.BlockSpec((Bt, S, E), lambda b: (b, 0, 0)),
            ),
            compiler_params=pltpu.CompilerParams(
                dimension_semantics=("parallel",),
                vmem_limit_bytes=vmem_limit_bytes,
            ),
        )

    try:
        # Constant-index weights -> single-buffer them (halves their VMEM
        # residency; critical headroom on v7x's 64 MiB VMEM).
        return build(single_buffer_weights=True)(src, *weight_inputs)
    except Exception:
        # pl.Buffered(1) not accepted by this jax version: default pipelining.
        return build(single_buffer_weights=False)(src, *weight_inputs)


def init_params(key, E, n_head, F=512, dtype=jnp.bfloat16):
    """Synthetic weights matching nn.MultiheadAttention / nn.Linear shapes.

    Stored pre-transposed (x @ W + b) and packed:
      ln_gb (4,E), w_qkv (E,3E) with 1/sqrt(D) folded into the Q columns,
      b_qkv (1,3E), wo (E,E), bo_bf2 (2,E), w1 (E,F), bf1 (1,F), w2 (F,E).
    Large matmul weights are stored in `dtype` (bf16 by default for MXU peak);
    LN params and biases stay f32.
    """
    ks = jax.random.split(key, 8)
    s = 0.05
    D = E // n_head

    w_in = jax.random.normal(ks[0], (3 * E, E), jnp.float32) * s   # in_proj_weight
    b_in = jax.random.normal(ks[1], (3 * E,), jnp.float32) * s     # in_proj_bias
    # Fold the attention scale into the Q third of the fused projection.
    scale = jnp.concatenate([
        jnp.full((E,), 1.0 / math.sqrt(D), jnp.float32),
        jnp.ones((2 * E,), jnp.float32),
    ])
    w_qkv = w_in.T * scale[None, :]                 # (E, 3E)
    b_qkv = (b_in * scale).reshape(1, 3 * E)

    wo = jax.random.normal(ks[2], (E, E), jnp.float32) * s          # out_proj.weight
    bo = jax.random.normal(ks[3], (E,), jnp.float32) * s
    w1 = jax.random.normal(ks[4], (F, E), jnp.float32) * s          # Linear(E, 512)
    bf1 = jax.random.normal(ks[5], (F,), jnp.float32) * s
    w2 = jax.random.normal(ks[6], (E, F), jnp.float32) * s          # Linear(512, E)
    bf2 = jax.random.normal(ks[7], (E,), jnp.float32) * s

    ln_gb = jnp.stack([jnp.ones((E,)), jnp.zeros((E,)),
                       jnp.ones((E,)), jnp.zeros((E,))], axis=0).astype(jnp.float32)

    return {
        "ln_gb": ln_gb,
        "w_qkv": w_qkv.astype(dtype),
        "b_qkv": b_qkv.astype(jnp.float32),
        "wo": wo.T.astype(dtype),
        "bo_bf2": jnp.stack([bo, bf2], axis=0).astype(jnp.float32),
        "w1": w1.T.astype(dtype),
        "bf1": bf1.reshape(1, F).astype(jnp.float32),
        "w2": w2.T.astype(dtype),
    }


def encoder_layer_ref(src, params, n_head):
    """Pure-JAX f32 reference of the PyTorch forward, using the same packed
    (possibly bf16-stored) weights upcast to f32; the 1/sqrt(D) scale is already
    folded into w_qkv/b_qkv so it is not applied again — mathematically
    identical to PyTorch's q/sqrt(D)."""
    def ln_f(x, g, b, eps=1e-6):
        mu = jnp.mean(x, -1, keepdims=True)
        var = jnp.mean((x - mu) ** 2, -1, keepdims=True)
        return (x - mu) * jax.lax.rsqrt(var + eps) * g + b

    B, S, E = src.shape
    H = n_head
    D = E // H
    ln = params["ln_gb"]
    g1, b1, g2, b2 = ln[0], ln[1], ln[2], ln[3]

    h = ln_f(src, g1, b1)
    qkv = h @ params["w_qkv"].astype(jnp.float32) + params["b_qkv"][0]
    q, k, v = qkv[..., :E], qkv[..., E:2 * E], qkv[..., 2 * E:]
    qh = q.reshape(B, S, H, D).transpose(0, 2, 1, 3)
    kh = k.reshape(B, S, H, D).transpose(0, 2, 1, 3)
    vh = v.reshape(B, S, H, D).transpose(0, 2, 1, 3)
    sc = jnp.einsum("bhqd,bhkd->bhqk", qh, kh)
    p = jax.nn.softmax(sc, axis=-1)
    ctx = jnp.einsum("bhqk,bhkd->bhqd", p, vh).transpose(0, 2, 1, 3).reshape(B, S, E)
    attn = ctx @ params["wo"].astype(jnp.float32) + params["bo_bf2"][0]
    h1 = src + attn
    hn = ln_f(h1, g2, b2)
    ff = jnp.maximum(hn @ params["w1"].astype(jnp.float32) + params["bf1"][0], 0.0)
    ff = ff @ params["w2"].astype(jnp.float32) + params["bo_bf2"][1]
    return h1 + ff


if __name__ == "__main__":
    B, S, E, n_head = 2, 8, 32, 4
    key = jax.random.PRNGKey(0)
    k_src, k_par = jax.random.split(key)
    src = jax.random.normal(k_src, (B, S, E), jnp.float32)
    params = init_params(k_par, E, n_head)   # bf16 matmul weights by default

    out = encoder_layer(src, params, n_head)
    out = jax.block_until_ready(out)

    ref = encoder_layer_ref(src, params, n_head)
    assert out.shape == (B, S, E)
    err = float(jnp.max(jnp.abs(out - ref)))
    # Tolerance covers bf16 matmul operands (f32-accumulated) and the
    # approximate (EUP) softmax reciprocal vs. the f32 reference.
    assert jnp.allclose(out, ref, atol=3e-2, rtol=3e-2), f"max abs err {err}"
    print("KERNEL_OK")
</pallas_src>

<mosaic_0001>
module attributes {stable_mosaic.version = 11 : i64} {
  func.func @encoder_layer_kernel(%arg0: i32, %arg1: memref<1x8x32xf32, #tpu.memory_space<vmem>>, %arg2: memref<4x32xf32, #tpu.memory_space<vmem>>, %arg3: memref<32x96xbf16, #tpu.memory_space<vmem>>, %arg4: memref<1x96xf32, #tpu.memory_space<vmem>>, %arg5: memref<32x32xbf16, #tpu.memory_space<vmem>>, %arg6: memref<2x32xf32, #tpu.memory_space<vmem>>, %arg7: memref<32x512xbf16, #tpu.memory_space<vmem>>, %arg8: memref<1x512xf32, #tpu.memory_space<vmem>>, %arg9: memref<512x32xbf16, #tpu.memory_space<vmem>>, %arg10: memref<1x8x32xf32, #tpu.memory_space<vmem>>) attributes {dimension_semantics = [#tpu.dimension_semantics<parallel>], iteration_bounds = array<i64: 2>, scalar_prefetch = 0 : i64, scratch_operands = 0 : i64, tpu.core_type = #tpu.core_type<tc>, window_params = [{transform_indices = @transform_0, window_bounds = array<i64: 1, 8, 32>}, {pipeline_mode = #tpu.pipeline_mode<synchronous>, transform_indices = @transform_1, window_bounds = array<i64: 4, 32>}, {pipeline_mode = #tpu.pipeline_mode<synchronous>, transform_indices = @transform_2, window_bounds = array<i64: 32, 96>}, {pipeline_mode = #tpu.pipeline_mode<synchronous>, transform_indices = @transform_3, window_bounds = array<i64: 1, 96>}, {pipeline_mode = #tpu.pipeline_mode<synchronous>, transform_indices = @transform_4, window_bounds = array<i64: 32, 32>}, {pipeline_mode = #tpu.pipeline_mode<synchronous>, transform_indices = @transform_5, window_bounds = array<i64: 2, 32>}, {pipeline_mode = #tpu.pipeline_mode<synchronous>, transform_indices = @transform_6, window_bounds = array<i64: 32, 512>}, {pipeline_mode = #tpu.pipeline_mode<synchronous>, transform_indices = @transform_7, window_bounds = array<i64: 1, 512>}, {pipeline_mode = #tpu.pipeline_mode<synchronous>, transform_indices = @transform_8, window_bounds = array<i64: 512, 32>}, {transform_indices = @transform_9, window_bounds = array<i64: 1, 8, 32>}]} {
    %c0 = arith.constant 0 : index
    %c0_0 = arith.constant 0 : index
    %c0_1 = arith.constant 0 : index
    %0 = vector.load %arg1[%c0, %c0_0, %c0_1] : memref<1x8x32xf32, #tpu.memory_space<vmem>>, vector<1x8x32xf32>
    %1 = vector.shape_cast %0 : vector<1x8x32xf32> to vector<8x32xf32>
    %c0_2 = arith.constant 0 : index
    %c0_3 = arith.constant 0 : index
    %2 = vector.load %arg2[%c0_2, %c0_3] : memref<4x32xf32, #tpu.memory_space<vmem>>, vector<4x32xf32>
    %3 = vector.extract_strided_slice %2 {offsets = [0, 0], sizes = [1, 32], strides = [1, 1]} : vector<4x32xf32> to vector<1x32xf32>
    %4 = vector.extract_strided_slice %2 {offsets = [1, 0], sizes = [1, 32], strides = [1, 1]} : vector<4x32xf32> to vector<1x32xf32>
    %5 = vector.extract_strided_slice %2 {offsets = [2, 0], sizes = [1, 32], strides = [1, 1]} : vector<4x32xf32> to vector<1x32xf32>
    %6 = vector.extract_strided_slice %2 {offsets = [3, 0], sizes = [1, 32], strides = [1, 1]} : vector<4x32xf32> to vector<1x32xf32>
    %c0_4 = arith.constant 0 : index
    %c0_5 = arith.constant 0 : index
    %7 = vector.load %arg6[%c0_4, %c0_5] : memref<2x32xf32, #tpu.memory_space<vmem>>, vector<2x32xf32>
    %8 = vector.extract_strided_slice %7 {offsets = [0, 0], sizes = [1, 32], strides = [1, 1]} : vector<2x32xf32> to vector<1x32xf32>
    %9 = vector.extract_strided_slice %7 {offsets = [1, 0], sizes = [1, 32], strides = [1, 1]} : vector<2x32xf32> to vector<1x32xf32>
    %cst = arith.constant dense<0.000000e+00> : vector<8xf32>
    %10 = vector.multi_reduction <add>, %1, %cst [1] : vector<8x32xf32> to vector<8xf32>
    %11 = vector.shape_cast %10 : vector<8xf32> to vector<8x1xf32>
    %cst_6 = arith.constant 3.200000e+01 : f32
    %12 = vector.broadcast %cst_6 : f32 to vector<8x1xf32>
    %13 = arith.divf %11, %12 : vector<8x1xf32>
    %14 = vector.broadcast %13 : vector<8x1xf32> to vector<8x32xf32>
    %15 = arith.subf %1, %14 : vector<8x32xf32>
    %16 = arith.mulf %15, %15 : vector<8x32xf32>
    %cst_7 = arith.constant dense<0.000000e+00> : vector<8xf32>
    %17 = vector.multi_reduction <add>, %16, %cst_7 [1] : vector<8x32xf32> to vector<8xf32>
    %18 = vector.shape_cast %17 : vector<8xf32> to vector<8x1xf32>
    %cst_8 = arith.constant 3.200000e+01 : f32
    %19 = vector.broadcast %cst_8 : f32 to vector<8x1xf32>
    %20 = arith.divf %18, %19 : vector<8x1xf32>
    %21 = vector.broadcast %13 : vector<8x1xf32> to vector<8x32xf32>
    %22 = arith.subf %1, %21 : vector<8x32xf32>
    %cst_9 = arith.constant 9.99999997E-7 : f32
    %23 = vector.broadcast %cst_9 : f32 to vector<8x1xf32>
    %24 = arith.addf %20, %23 : vector<8x1xf32>
    %25 = math.rsqrt %24 : vector<8x1xf32>
    %26 = vector.broadcast %25 : vector<8x1xf32> to vector<8x32xf32>
    %27 = arith.mulf %22, %26 : vector<8x32xf32>
    %28 = vector.broadcast %3 : vector<1x32xf32> to vector<8x32xf32>
    %29 = arith.mulf %27, %28 : vector<8x32xf32>
    %30 = vector.broadcast %4 : vector<1x32xf32> to vector<8x32xf32>
    %31 = arith.addf %29, %30 : vector<8x32xf32>
    %32 = arith.truncf %31 : vector<8x32xf32> to vector<8x32xbf16>
    %c0_10 = arith.constant 0 : index
    %c0_11 = arith.constant 0 : index
    %33 = vector.load %arg3[%c0_10, %c0_11] : memref<32x96xbf16, #tpu.memory_space<vmem>>, vector<32x96xbf16>
    %cst_12 = arith.constant dense<0.000000e+00> : vector<8x96xf32>
    %34 = tpu.matmul %32, %33, %cst_12 {dimension_numbers = #tpu.dot_dimension_numbers<[1], [0], [0], [1], [0, 0, 1, 1], [], []>} : vector<8x32xbf16>, vector<32x96xbf16>, vector<8x96xf32> -> vector<8x96xf32>
    %c0_13 = arith.constant 0 : index
    %c0_14 = arith.constant 0 : index
    %35 = vector.load %arg4[%c0_13, %c0_14] : memref<1x96xf32, #tpu.memory_space<vmem>>, vector<1x96xf32>
    %36 = vector.broadcast %35 : vector<1x96xf32> to vector<8x96xf32>
    %37 = arith.addf %34, %36 : vector<8x96xf32>
    %38 = vector.shape_cast %37 : vector<8x96xf32> to vector<1x8x96xf32>
    %39 = arith.truncf %38 : vector<1x8x96xf32> to vector<1x8x96xbf16>
    %40 = vector.extract_strided_slice %39 {offsets = [0, 0, 0], sizes = [1, 8, 8], strides = [1, 1, 1]} : vector<1x8x96xbf16> to vector<1x8x8xbf16>
    %41 = vector.extract_strided_slice %39 {offsets = [0, 0, 32], sizes = [1, 8, 8], strides = [1, 1, 1]} : vector<1x8x96xbf16> to vector<1x8x8xbf16>
    %42 = vector.extract_strided_slice %39 {offsets = [0, 0, 64], sizes = [1, 8, 8], strides = [1, 1, 1]} : vector<1x8x96xbf16> to vector<1x8x8xbf16>
    "tpu.trace_start"() <{level = 10 : i32, message = "bqd,bkd->bqk"}> : () -> ()
    %cst_15 = arith.constant dense<0.000000e+00> : vector<1x8x8xf32>
    %43 = tpu.matmul %40, %41, %cst_15 {dimension_numbers = #tpu.dot_dimension_numbers<[2], [2], [1], [1], [0, 0, 0, 1, 1, 1], [0], [0]>} : vector<1x8x8xbf16>, vector<1x8x8xbf16>, vector<1x8x8xf32> -> vector<1x8x8xf32>
    "tpu.trace_stop"() : () -> ()
    %cst_16 = arith.constant dense<0xFF800000> : vector<1x8xf32>
    %44 = vector.multi_reduction <maximumf>, %43, %cst_16 [2] : vector<1x8x8xf32> to vector<1x8xf32>
    %45 = vector.shape_cast %44 : vector<1x8xf32> to vector<1x8x1xf32>
    %46 = vector.broadcast %45 : vector<1x8x1xf32> to vector<1x8x8xf32>
    %47 = arith.subf %43, %46 : vector<1x8x8xf32>
    %48 = math.exp %47 : vector<1x8x8xf32>
    %cst_17 = arith.constant dense<0.000000e+00> : vector<1x8xf32>
    %49 = vector.multi_reduction <add>, %48, %cst_17 [2] : vector<1x8x8xf32> to vector<1x8xf32>
    %50 = vector.shape_cast %49 : vector<1x8xf32> to vector<1x8x1xf32>
    %51 = tpu.reciprocal %50 {approx = true} : vector<1x8x1xf32> -> vector<1x8x1xf32>
    %52 = vector.broadcast %51 : vector<1x8x1xf32> to vector<1x8x8xf32>
    %53 = arith.mulf %48, %52 : vector<1x8x8xf32>
    %54 = arith.truncf %53 : vector<1x8x8xf32> to vector<1x8x8xbf16>
    "tpu.trace_start"() <{level = 10 : i32, message = "bqk,bkd->bqd"}> : () -> ()
    %cst_18 = arith.constant dense<0.000000e+00> : vector<1x8x8xf32>
    %55 = tpu.matmul %54, %42, %cst_18 {dimension_numbers = #tpu.dot_dimension_numbers<[2], [1], [1], [2], [0, 0, 0, 1, 1, 2], [0], [0]>} : vector<1x8x8xbf16>, vector<1x8x8xbf16>, vector<1x8x8xf32> -> vector<1x8x8xf32>
    "tpu.trace_stop"() : () -> ()
    %56 = arith.truncf %55 : vector<1x8x8xf32> to vector<1x8x8xbf16>
    %57 = vector.extract_strided_slice %39 {offsets = [0, 0, 8], sizes = [1, 8, 8], strides = [1, 1, 1]} : vector<1x8x96xbf16> to vector<1x8x8xbf16>
    %58 = vector.extract_strided_slice %39 {offsets = [0, 0, 40], sizes = [1, 8, 8], strides = [1, 1, 1]} : vector<1x8x96xbf16> to vector<1x8x8xbf16>
    %59 = vector.extract_strided_slice %39 {offsets = [0, 0, 72], sizes = [1, 8, 8], strides = [1, 1, 1]} : vector<1x8x96xbf16> to vector<1x8x8xbf16>
    "tpu.trace_start"() <{level = 10 : i32, message = "bqd,bkd->bqk"}> : () -> ()
    %cst_19 = arith.constant dense<0.000000e+00> : vector<1x8x8xf32>
    %60 = tpu.matmul %57, %58, %cst_19 {dimension_numbers = #tpu.dot_dimension_numbers<[2], [2], [1], [1], [0, 0, 0, 1, 1, 1], [0], [0]>} : vector<1x8x8xbf16>, vector<1x8x8xbf16>, vector<1x8x8xf32> -> vector<1x8x8xf32>
    "tpu.trace_stop"() : () -> ()
    %cst_20 = arith.constant dense<0xFF800000> : vector<1x8xf32>
    %61 = vector.multi_reduction <maximumf>, %60, %cst_20 [2] : vector<1x8x8xf32> to vector<1x8xf32>
    %62 = vector.shape_cast %61 : vector<1x8xf32> to vector<1x8x1xf32>
    %63 = vector.broadcast %62 : vector<1x8x1xf32> to vector<1x8x8xf32>
    %64 = arith.subf %60, %63 : vector<1x8x8xf32>
    %65 = math.exp %64 : vector<1x8x8xf32>
    %cst_21 = arith.constant dense<0.000000e+00> : vector<1x8xf32>
    %66 = vector.multi_reduction <add>, %65, %cst_21 [2] : vector<1x8x8xf32> to vector<1x8xf32>
    %67 = vector.shape_cast %66 : vector<1x8xf32> to vector<1x8x1xf32>
    %68 = tpu.reciprocal %67 {approx = true} : vector<1x8x1xf32> -> vector<1x8x1xf32>
    %69 = vector.broadcast %68 : vector<1x8x1xf32> to vector<1x8x8xf32>
    %70 = arith.mulf %65, %69 : vector<1x8x8xf32>
    %71 = arith.truncf %70 : vector<1x8x8xf32> to vector<1x8x8xbf16>
    "tpu.trace_start"() <{level = 10 : i32, message = "bqk,bkd->bqd"}> : () -> ()
    %cst_22 = arith.constant dense<0.000000e+00> : vector<1x8x8xf32>
    %72 = tpu.matmul %71, %59, %cst_22 {dimension_numbers = #tpu.dot_dimension_numbers<[2], [1], [1], [2], [0, 0, 0, 1, 1, 2], [0], [0]>} : vector<1x8x8xbf16>, vector<1x8x8xbf16>, vector<1x8x8xf32> -> vector<1x8x8xf32>
    "tpu.trace_stop"() : () -> ()
    %73 = arith.truncf %72 : vector<1x8x8xf32> to vector<1x8x8xbf16>
    %74 = vector.extract_strided_slice %39 {offsets = [0, 0, 16], sizes = [1, 8, 8], strides = [1, 1, 1]} : vector<1x8x96xbf16> to vector<1x8x8xbf16>
    %75 = vector.extract_strided_slice %39 {offsets = [0, 0, 48], sizes = [1, 8, 8], strides = [1, 1, 1]} : vector<1x8x96xbf16> to vector<1x8x8xbf16>
    %76 = vector.extract_strided_slice %39 {offsets = [0, 0, 80], sizes = [1, 8, 8], strides = [1, 1, 1]} : vector<1x8x96xbf16> to vector<1x8x8xbf16>
    "tpu.trace_start"() <{level = 10 : i32, message = "bqd,bkd->bqk"}> : () -> ()
    %cst_23 = arith.constant dense<0.000000e+00> : vector<1x8x8xf32>
    %77 = tpu.matmul %74, %75, %cst_23 {dimension_numbers = #tpu.dot_dimension_numbers<[2], [2], [1], [1], [0, 0, 0, 1, 1, 1], [0], [0]>} : vector<1x8x8xbf16>, vector<1x8x8xbf16>, vector<1x8x8xf32> -> vector<1x8x8xf32>
    "tpu.trace_stop"() : () -> ()
    %cst_24 = arith.constant dense<0xFF800000> : vector<1x8xf32>
    %78 = vector.multi_reduction <maximumf>, %77, %cst_24 [2] : vector<1x8x8xf32> to vector<1x8xf32>
    %79 = vector.shape_cast %78 : vector<1x8xf32> to vector<1x8x1xf32>
    %80 = vector.broadcast %79 : vector<1x8x1xf32> to vector<1x8x8xf32>
    %81 = arith.subf %77, %80 : vector<1x8x8xf32>
    %82 = math.exp %81 : vector<1x8x8xf32>
    %cst_25 = arith.constant dense<0.000000e+00> : vector<1x8xf32>
    %83 = vector.multi_reduction <add>, %82, %cst_25 [2] : vector<1x8x8xf32> to vector<1x8xf32>
    %84 = vector.shape_cast %83 : vector<1x8xf32> to vector<1x8x1xf32>
    %85 = tpu.reciprocal %84 {approx = true} : vector<1x8x1xf32> -> vector<1x8x1xf32>
    %86 = vector.broadcast %85 : vector<1x8x1xf32> to vector<1x8x8xf32>
    %87 = arith.mulf %82, %86 : vector<1x8x8xf32>
    %88 = arith.truncf %87 : vector<1x8x8xf32> to vector<1x8x8xbf16>
    "tpu.trace_start"() <{level = 10 : i32, message = "bqk,bkd->bqd"}> : () -> ()
    %cst_26 = arith.constant dense<0.000000e+00> : vector<1x8x8xf32>
    %89 = tpu.matmul %88, %76, %cst_26 {dimension_numbers = #tpu.dot_dimension_numbers<[2], [1], [1], [2], [0, 0, 0, 1, 1, 2], [0], [0]>} : vector<1x8x8xbf16>, vector<1x8x8xbf16>, vector<1x8x8xf32> -> vector<1x8x8xf32>
    "tpu.trace_stop"() : () -> ()
    %90 = arith.truncf %89 : vector<1x8x8xf32> to vector<1x8x8xbf16>
    %91 = vector.extract_strided_slice %39 {offsets = [0, 0, 24], sizes = [1, 8, 8], strides = [1, 1, 1]} : vector<1x8x96xbf16> to vector<1x8x8xbf16>
    %92 = vector.extract_strided_slice %39 {offsets = [0, 0, 56], sizes = [1, 8, 8], strides = [1, 1, 1]} : vector<1x8x96xbf16> to vector<1x8x8xbf16>
    %93 = vector.extract_strided_slice %39 {offsets = [0, 0, 88], sizes = [1, 8, 8], strides = [1, 1, 1]} : vector<1x8x96xbf16> to vector<1x8x8xbf16>
    "tpu.trace_start"() <{level = 10 : i32, message = "bqd,bkd->bqk"}> : () -> ()
    %cst_27 = arith.constant dense<0.000000e+00> : vector<1x8x8xf32>
    %94 = tpu.matmul %91, %92, %cst_27 {dimension_numbers = #tpu.dot_dimension_numbers<[2], [2], [1], [1], [0, 0, 0, 1, 1, 1], [0], [0]>} : vector<1x8x8xbf16>, vector<1x8x8xbf16>, vector<1x8x8xf32> -> vector<1x8x8xf32>
    "tpu.trace_stop"() : () -> ()
    %cst_28 = arith.constant dense<0xFF800000> : vector<1x8xf32>
    %95 = vector.multi_reduction <maximumf>, %94, %cst_28 [2] : vector<1x8x8xf32> to vector<1x8xf32>
    %96 = vector.shape_cast %95 : vector<1x8xf32> to vector<1x8x1xf32>
    %97 = vector.broadcast %96 : vector<1x8x1xf32> to vector<1x8x8xf32>
    %98 = arith.subf %94, %97 : vector<1x8x8xf32>
    %99 = math.exp %98 : vector<1x8x8xf32>
    %cst_29 = arith.constant dense<0.000000e+00> : vector<1x8xf32>
    %100 = vector.multi_reduction <add>, %99, %cst_29 [2] : vector<1x8x8xf32> to vector<1x8xf32>
    %101 = vector.shape_cast %100 : vector<1x8xf32> to vector<1x8x1xf32>
    %102 = tpu.reciprocal %101 {approx = true} : vector<1x8x1xf32> -> vector<1x8x1xf32>
    %103 = vector.broadcast %102 : vector<1x8x1xf32> to vector<1x8x8xf32>
    %104 = arith.mulf %99, %103 : vector<1x8x8xf32>
    %105 = arith.truncf %104 : vector<1x8x8xf32> to vector<1x8x8xbf16>
    "tpu.trace_start"() <{level = 10 : i32, message = "bqk,bkd->bqd"}> : () -> ()
    %cst_30 = arith.constant dense<0.000000e+00> : vector<1x8x8xf32>
    %106 = tpu.matmul %105, %93, %cst_30 {dimension_numbers = #tpu.dot_dimension_numbers<[2], [1], [1], [2], [0, 0, 0, 1, 1, 2], [0], [0]>} : vector<1x8x8xbf16>, vector<1x8x8xbf16>, vector<1x8x8xf32> -> vector<1x8x8xf32>
    "tpu.trace_stop"() : () -> ()
    %107 = arith.truncf %106 : vector<1x8x8xf32> to vector<1x8x8xbf16>
    %108 = tpu.concatenate %56, %73, %90, %107 in 2 : vector<1x8x8xbf16>, vector<1x8x8xbf16>, vector<1x8x8xbf16>, vector<1x8x8xbf16> -> vector<1x8x32xbf16>
    %109 = vector.shape_cast %108 : vector<1x8x32xbf16> to vector<8x32xbf16>
    %c0_31 = arith.constant 0 : index
    %c0_32 = arith.constant 0 : index
    %110 = vector.load %arg5[%c0_31, %c0_32] : memref<32x32xbf16, #tpu.memory_space<vmem>>, vector<32x32xbf16>
    %cst_33 = arith.constant dense<0.000000e+00> : vector<8x32xf32>
    %111 = tpu.matmul %109, %110, %cst_33 {dimension_numbers = #tpu.dot_dimension_numbers<[1], [0], [0], [1], [0, 0, 1, 1], [], []>} : vector<8x32xbf16>, vector<32x32xbf16>, vector<8x32xf32> -> vector<8x32xf32>
    %112 = vector.broadcast %8 : vector<1x32xf32> to vector<8x32xf32>
    %113 = arith.addf %111, %112 : vector<8x32xf32>
    %114 = arith.addf %1, %113 : vector<8x32xf32>
    %cst_34 = arith.constant dense<0.000000e+00> : vector<8xf32>
    %115 = vector.multi_reduction <add>, %114, %cst_34 [1] : vector<8x32xf32> to vector<8xf32>
    %116 = vector.shape_cast %115 : vector<8xf32> to vector<8x1xf32>
    %cst_35 = arith.constant 3.200000e+01 : f32
    %117 = vector.broadcast %cst_35 : f32 to vector<8x1xf32>
    %118 = arith.divf %116, %117 : vector<8x1xf32>
    %119 = vector.broadcast %118 : vector<8x1xf32> to vector<8x32xf32>
    %120 = arith.subf %114, %119 : vector<8x32xf32>
    %121 = arith.mulf %120, %120 : vector<8x32xf32>
    %cst_36 = arith.constant dense<0.000000e+00> : vector<8xf32>
    %122 = vector.multi_reduction <add>, %121, %cst_36 [1] : vector<8x32xf32> to vector<8xf32>
    %123 = vector.shape_cast %122 : vector<8xf32> to vector<8x1xf32>
    %cst_37 = arith.constant 3.200000e+01 : f32
    %124 = vector.broadcast %cst_37 : f32 to vector<8x1xf32>
    %125 = arith.divf %123, %124 : vector<8x1xf32>
    %126 = vector.broadcast %118 : vector<8x1xf32> to vector<8x32xf32>
    %127 = arith.subf %114, %126 : vector<8x32xf32>
    %cst_38 = arith.constant 9.99999997E-7 : f32
    %128 = vector.broadcast %cst_38 : f32 to vector<8x1xf32>
    %129 = arith.addf %125, %128 : vector<8x1xf32>
    %130 = math.rsqrt %129 : vector<8x1xf32>
    %131 = vector.broadcast %130 : vector<8x1xf32> to vector<8x32xf32>
    %132 = arith.mulf %127, %131 : vector<8x32xf32>
    %133 = vector.broadcast %5 : vector<1x32xf32> to vector<8x32xf32>
    %134 = arith.mulf %132, %133 : vector<8x32xf32>
    %135 = vector.broadcast %6 : vector<1x32xf32> to vector<8x32xf32>
    %136 = arith.addf %134, %135 : vector<8x32xf32>
    %137 = arith.truncf %136 : vector<8x32xf32> to vector<8x32xbf16>
    %c0_39 = arith.constant 0 : index
    %c0_40 = arith.constant 0 : index
    %138 = vector.load %arg7[%c0_39, %c0_40] : memref<32x512xbf16, #tpu.memory_space<vmem>>, vector<32x512xbf16>
    %cst_41 = arith.constant dense<0.000000e+00> : vector<8x512xf32>
    %139 = tpu.matmul %137, %138, %cst_41 {dimension_numbers = #tpu.dot_dimension_numbers<[1], [0], [0], [1], [0, 0, 1, 1], [], []>} : vector<8x32xbf16>, vector<32x512xbf16>, vector<8x512xf32> -> vector<8x512xf32>
    %c0_42 = arith.constant 0 : index
    %c0_43 = arith.constant 0 : index
    %140 = vector.load %arg8[%c0_42, %c0_43] : memref<1x512xf32, #tpu.memory_space<vmem>>, vector<1x512xf32>
    %141 = vector.broadcast %140 : vector<1x512xf32> to vector<8x512xf32>
    %142 = arith.addf %139, %141 : vector<8x512xf32>
    %cst_44 = arith.constant 0.000000e+00 : f32
    %143 = vector.broadcast %cst_44 : f32 to vector<8x512xf32>
    %144 = arith.maximumf %142, %143 : vector<8x512xf32>
    %145 = arith.truncf %144 : vector<8x512xf32> to vector<8x512xbf16>
    %c0_45 = arith.constant 0 : index
    %c0_46 = arith.constant 0 : index
    %146 = vector.load %arg9[%c0_45, %c0_46] : memref<512x32xbf16, #tpu.memory_space<vmem>>, vector<512x32xbf16>
    %cst_47 = arith.constant dense<0.000000e+00> : vector<8x32xf32>
    %147 = tpu.matmul %145, %146, %cst_47 {dimension_numbers = #tpu.dot_dimension_numbers<[1], [0], [0], [1], [0, 0, 1, 1], [], []>} : vector<8x512xbf16>, vector<512x32xbf16>, vector<8x32xf32> -> vector<8x32xf32>
    %148 = vector.broadcast %9 : vector<1x32xf32> to vector<8x32xf32>
    %149 = arith.addf %147, %148 : vector<8x32xf32>
    %150 = arith.addf %114, %149 : vector<8x32xf32>
    %151 = vector.shape_cast %150 : vector<8x32xf32> to vector<1x8x32xf32>
    %c0_48 = arith.constant 0 : index
    %c0_49 = arith.constant 0 : index
    %c0_50 = arith.constant 0 : index
    %152 = vector.load %arg10[%c0_48, %c0_49, %c0_50] : memref<1x8x32xf32, #tpu.memory_space<vmem>>, vector<1x8x32xf32>
    tpu.vector_store %arg10[%c0_48, %c0_49, %c0_50], %151 {strides = array<i32>} : memref<1x8x32xf32, #tpu.memory_space<vmem>>, vector<1x8x32xf32>,
    return
  }
  func.func @transform_0(%arg0: i32) -> (i32, i32, i32) {
    %c0_i32 = arith.constant 0 : i32
    %c0_i32_0 = arith.constant 0 : i32
    %c0_i32_1 = arith.constant 0 : i32
    return %arg0, %c0_i32, %c0_i32_0 : i32, i32, i32
  }
  func.func @transform_1(%arg0: i32) -> (i32, i32) {
    %c0_i32 = arith.constant 0 : i32
    %c0_i32_0 = arith.constant 0 : i32
    %c0_i32_1 = arith.constant 0 : i32
    return %c0_i32, %c0_i32_0 : i32, i32
  }
  func.func @transform_2(%arg0: i32) -> (i32, i32) {
    %c0_i32 = arith.constant 0 : i32
    %c0_i32_0 = arith.constant 0 : i32
    %c0_i32_1 = arith.constant 0 : i32
    return %c0_i32, %c0_i32_0 : i32, i32
  }
  func.func @transform_3(%arg0: i32) -> (i32, i32) {
    %c0_i32 = arith.constant 0 : i32
    %c0_i32_0 = arith.constant 0 : i32
    %c0_i32_1 = arith.constant 0 : i32
    return %c0_i32, %c0_i32_0 : i32, i32
  }
  func.func @transform_4(%arg0: i32) -> (i32, i32) {
    %c0_i32 = arith.constant 0 : i32
    %c0_i32_0 = arith.constant 0 : i32
    %c0_i32_1 = arith.constant 0 : i32
    return %c0_i32, %c0_i32_0 : i32, i32
  }
  func.func @transform_5(%arg0: i32) -> (i32, i32) {
    %c0_i32 = arith.constant 0 : i32
    %c0_i32_0 = arith.constant 0 : i32
    %c0_i32_1 = arith.constant 0 : i32
    return %c0_i32, %c0_i32_0 : i32, i32
  }
  func.func @transform_6(%arg0: i32) -> (i32, i32) {
    %c0_i32 = arith.constant 0 : i32
    %c0_i32_0 = arith.constant 0 : i32
    %c0_i32_1 = arith.constant 0 : i32
    return %c0_i32, %c0_i32_0 : i32, i32
  }
  func.func @transform_7(%arg0: i32) -> (i32, i32) {
    %c0_i32 = arith.constant 0 : i32
    %c0_i32_0 = arith.constant 0 : i32
    %c0_i32_1 = arith.constant 0 : i32
    return %c0_i32, %c0_i32_0 : i32, i32
  }
  func.func @transform_8(%arg0: i32) -> (i32, i32) {
    %c0_i32 = arith.constant 0 : i32
    %c0_i32_0 = arith.constant 0 : i32
    %c0_i32_1 = arith.constant 0 : i32
    return %c0_i32, %c0_i32_0 : i32, i32
  }
  func.func @transform_9(%arg0: i32) -> (i32, i32, i32) {
    %c0_i32 = arith.constant 0 : i32
    %c0_i32_0 = arith.constant 0 : i32
    %c0_i32_1 = arith.constant 0 : i32
    return %arg0, %c0_i32, %c0_i32_0 : i32, i32, i32
  }
}

module attributes {stable_mosaic.version = 11 : i64} {
  func.func @encoder_layer_kernel(%arg0: i32, %arg1: memref<1x8x32xf32, #tpu.memory_space<vmem>>, %arg2: memref<4x32xf32, #tpu.memory_space<vmem>>, %arg3: memref<32x96xbf16, #tpu.memory_space<vmem>>, %arg4: memref<1x96xf32, #tpu.memory_space<vmem>>, %arg5: memref<32x32xbf16, #tpu.memory_space<vmem>>, %arg6: memref<2x32xf32, #tpu.memory_space<vmem>>, %arg7: memref<32x512xbf16, #tpu.memory_space<vmem>>, %arg8: memref<1x512xf32, #tpu.memory_space<vmem>>, %arg9: memref<512x32xbf16, #tpu.memory_space<vmem>>, %arg10: memref<1x8x32xf32, #tpu.memory_space<vmem>>) attributes {dimension_semantics = [#tpu.dimension_semantics<parallel>], iteration_bounds = array<i64: 2>, scalar_prefetch = 0 : i64, scratch_operands = 0 : i64, tpu.core_type = #tpu.core_type<tc>, window_params = [{transform_indices = @transform_0, window_bounds = array<i64: 1, 8, 32>}, {pipeline_mode = #tpu.pipeline_mode<synchronous>, transform_indices = @transform_1, window_bounds = array<i64: 4, 32>}, {pipeline_mode = #tpu.pipeline_mode<synchronous>, transform_indices = @transform_2, window_bounds = array<i64: 32, 96>}, {pipeline_mode = #tpu.pipeline_mode<synchronous>, transform_indices = @transform_3, window_bounds = array<i64: 1, 96>}, {pipeline_mode = #tpu.pipeline_mode<synchronous>, transform_indices = @transform_4, window_bounds = array<i64: 32, 32>}, {pipeline_mode = #tpu.pipeline_mode<synchronous>, transform_indices = @transform_5, window_bounds = array<i64: 2, 32>}, {pipeline_mode = #tpu.pipeline_mode<synchronous>, transform_indices = @transform_6, window_bounds = array<i64: 32, 512>}, {pipeline_mode = #tpu.pipeline_mode<synchronous>, transform_indices = @transform_7, window_bounds = array<i64: 1, 512>}, {pipeline_mode = #tpu.pipeline_mode<synchronous>, transform_indices = @transform_8, window_bounds = array<i64: 512, 32>}, {transform_indices = @transform_9, window_bounds = array<i64: 1, 8, 32>}]} {
    %c0 = arith.constant 0 : index
    %c0_0 = arith.constant 0 : index
    %c0_1 = arith.constant 0 : index
    %0 = vector.load %arg1[%c0, %c0_0, %c0_1] : memref<1x8x32xf32, #tpu.memory_space<vmem>>, vector<1x8x32xf32>
    %1 = vector.shape_cast %0 : vector<1x8x32xf32> to vector<8x32xf32>
    %c0_2 = arith.constant 0 : index
    %c0_3 = arith.constant 0 : index
    %2 = vector.load %arg2[%c0_2, %c0_3] : memref<4x32xf32, #tpu.memory_space<vmem>>, vector<4x32xf32>
    %3 = vector.extract_strided_slice %2 {offsets = [0, 0], sizes = [1, 32], strides = [1, 1]} : vector<4x32xf32> to vector<1x32xf32>
    %4 = vector.extract_strided_slice %2 {offsets = [1, 0], sizes = [1, 32], strides = [1, 1]} : vector<4x32xf32> to vector<1x32xf32>
    %5 = vector.extract_strided_slice %2 {offsets = [2, 0], sizes = [1, 32], strides = [1, 1]} : vector<4x32xf32> to vector<1x32xf32>
    %6 = vector.extract_strided_slice %2 {offsets = [3, 0], sizes = [1, 32], strides = [1, 1]} : vector<4x32xf32> to vector<1x32xf32>
    %c0_4 = arith.constant 0 : index
    %c0_5 = arith.constant 0 : index
    %7 = vector.load %arg6[%c0_4, %c0_5] : memref<2x32xf32, #tpu.memory_space<vmem>>, vector<2x32xf32>
    %8 = vector.extract_strided_slice %7 {offsets = [0, 0], sizes = [1, 32], strides = [1, 1]} : vector<2x32xf32> to vector<1x32xf32>
    %9 = vector.extract_strided_slice %7 {offsets = [1, 0], sizes = [1, 32], strides = [1, 1]} : vector<2x32xf32> to vector<1x32xf32>
    %cst = arith.constant dense<0.000000e+00> : vector<8xf32>
    %10 = vector.multi_reduction <add>, %1, %cst [1] : vector<8x32xf32> to vector<8xf32>
    %11 = vector.shape_cast %10 : vector<8xf32> to vector<8x1xf32>
    %cst_6 = arith.constant 3.200000e+01 : f32
    %12 = vector.broadcast %cst_6 : f32 to vector<8x1xf32>
    %13 = arith.divf %11, %12 : vector<8x1xf32>
    %14 = vector.broadcast %13 : vector<8x1xf32> to vector<8x32xf32>
    %15 = arith.subf %1, %14 : vector<8x32xf32>
    %16 = arith.mulf %15, %15 : vector<8x32xf32>
    %cst_7 = arith.constant dense<0.000000e+00> : vector<8xf32>
    %17 = vector.multi_reduction <add>, %16, %cst_7 [1] : vector<8x32xf32> to vector<8xf32>
    %18 = vector.shape_cast %17 : vector<8xf32> to vector<8x1xf32>
    %cst_8 = arith.constant 3.200000e+01 : f32
    %19 = vector.broadcast %cst_8 : f32 to vector<8x1xf32>
    %20 = arith.divf %18, %19 : vector<8x1xf32>
    %21 = vector.broadcast %13 : vector<8x1xf32> to vector<8x32xf32>
    %22 = arith.subf %1, %21 : vector<8x32xf32>
    %cst_9 = arith.constant 9.99999997E-7 : f32
    %23 = vector.broadcast %cst_9 : f32 to vector<8x1xf32>
    %24 = arith.addf %20, %23 : vector<8x1xf32>
    %25 = math.rsqrt %24 : vector<8x1xf32>
    %26 = vector.broadcast %25 : vector<8x1xf32> to vector<8x32xf32>
    %27 = arith.mulf %22, %26 : vector<8x32xf32>
    %28 = vector.broadcast %3 : vector<1x32xf32> to vector<8x32xf32>
    %29 = arith.mulf %27, %28 : vector<8x32xf32>
    %30 = vector.broadcast %4 : vector<1x32xf32> to vector<8x32xf32>
    %31 = arith.addf %29, %30 : vector<8x32xf32>
    %32 = arith.truncf %31 : vector<8x32xf32> to vector<8x32xbf16>
    %c0_10 = arith.constant 0 : index
    %c0_11 = arith.constant 0 : index
    %33 = vector.load %arg3[%c0_10, %c0_11] : memref<32x96xbf16, #tpu.memory_space<vmem>>, vector<32x96xbf16>
    %cst_12 = arith.constant dense<0.000000e+00> : vector<8x96xf32>
    %34 = tpu.matmul %32, %33, %cst_12 {dimension_numbers = #tpu.dot_dimension_numbers<[1], [0], [0], [1], [0, 0, 1, 1], [], []>} : vector<8x32xbf16>, vector<32x96xbf16>, vector<8x96xf32> -> vector<8x96xf32>
    %c0_13 = arith.constant 0 : index
    %c0_14 = arith.constant 0 : index
    %35 = vector.load %arg4[%c0_13, %c0_14] : memref<1x96xf32, #tpu.memory_space<vmem>>, vector<1x96xf32>
    %36 = vector.broadcast %35 : vector<1x96xf32> to vector<8x96xf32>
    %37 = arith.addf %34, %36 : vector<8x96xf32>
    %38 = vector.shape_cast %37 : vector<8x96xf32> to vector<1x8x96xf32>
    %39 = arith.truncf %38 : vector<1x8x96xf32> to vector<1x8x96xbf16>
    %40 = vector.extract_strided_slice %39 {offsets = [0, 0, 0], sizes = [1, 8, 8], strides = [1, 1, 1]} : vector<1x8x96xbf16> to vector<1x8x8xbf16>
    %41 = vector.extract_strided_slice %39 {offsets = [0, 0, 32], sizes = [1, 8, 8], strides = [1, 1, 1]} : vector<1x8x96xbf16> to vector<1x8x8xbf16>
    %42 = vector.extract_strided_slice %39 {offsets = [0, 0, 64], sizes = [1, 8, 8], strides = [1, 1, 1]} : vector<1x8x96xbf16> to vector<1x8x8xbf16>
    "tpu.trace_start"() <{level = 10 : i32, message = "bqd,bkd->bqk"}> : () -> ()
    %cst_15 = arith.constant dense<0.000000e+00> : vector<1x8x8xf32>
    %43 = tpu.matmul %40, %41, %cst_15 {dimension_numbers = #tpu.dot_dimension_numbers<[2], [2], [1], [1], [0, 0, 0, 1, 1, 1], [0], [0]>} : vector<1x8x8xbf16>, vector<1x8x8xbf16>, vector<1x8x8xf32> -> vector<1x8x8xf32>
    "tpu.trace_stop"() : () -> ()
    %cst_16 = arith.constant dense<0xFF800000> : vector<1x8xf32>
    %44 = vector.multi_reduction <maximumf>, %43, %cst_16 [2] : vector<1x8x8xf32> to vector<1x8xf32>
    %45 = vector.shape_cast %44 : vector<1x8xf32> to vector<1x8x1xf32>
    %46 = vector.broadcast %45 : vector<1x8x1xf32> to vector<1x8x8xf32>
    %47 = arith.subf %43, %46 : vector<1x8x8xf32>
    %48 = math.exp %47 : vector<1x8x8xf32>
    %cst_17 = arith.constant dense<0.000000e+00> : vector<1x8xf32>
    %49 = vector.multi_reduction <add>, %48, %cst_17 [2] : vector<1x8x8xf32> to vector<1x8xf32>
    %50 = vector.shape_cast %49 : vector<1x8xf32> to vector<1x8x1xf32>
    %51 = tpu.reciprocal %50 {approx = true} : vector<1x8x1xf32> -> vector<1x8x1xf32>
    %52 = vector.broadcast %51 : vector<1x8x1xf32> to vector<1x8x8xf32>
    %53 = arith.mulf %48, %52 : vector<1x8x8xf32>
    %54 = arith.truncf %53 : vector<1x8x8xf32> to vector<1x8x8xbf16>
    "tpu.trace_start"() <{level = 10 : i32, message = "bqk,bkd->bqd"}> : () -> ()
    %cst_18 = arith.constant dense<0.000000e+00> : vector<1x8x8xf32>
    %55 = tpu.matmul %54, %42, %cst_18 {dimension_numbers = #tpu.dot_dimension_numbers<[2], [1], [1], [2], [0, 0, 0, 1, 1, 2], [0], [0]>} : vector<1x8x8xbf16>, vector<1x8x8xbf16>, vector<1x8x8xf32> -> vector<1x8x8xf32>
    "tpu.trace_stop"() : () -> ()
    %56 = arith.truncf %55 : vector<1x8x8xf32> to vector<1x8x8xbf16>
    %57 = vector.extract_strided_slice %39 {offsets = [0, 0, 8], sizes = [1, 8, 8], strides = [1, 1, 1]} : vector<1x8x96xbf16> to vector<1x8x8xbf16>
    %58 = vector.extract_strided_slice %39 {offsets = [0, 0, 40], sizes = [1, 8, 8], strides = [1, 1, 1]} : vector<1x8x96xbf16> to vector<1x8x8xbf16>
    %59 = vector.extract_strided_slice %39 {offsets = [0, 0, 72], sizes = [1, 8, 8], strides = [1, 1, 1]} : vector<1x8x96xbf16> to vector<1x8x8xbf16>
    "tpu.trace_start"() <{level = 10 : i32, message = "bqd,bkd->bqk"}> : () -> ()
    %cst_19 = arith.constant dense<0.000000e+00> : vector<1x8x8xf32>
    %60 = tpu.matmul %57, %58, %cst_19 {dimension_numbers = #tpu.dot_dimension_numbers<[2], [2], [1], [1], [0, 0, 0, 1, 1, 1], [0], [0]>} : vector<1x8x8xbf16>, vector<1x8x8xbf16>, vector<1x8x8xf32> -> vector<1x8x8xf32>
    "tpu.trace_stop"() : () -> ()
    %cst_20 = arith.constant dense<0xFF800000> : vector<1x8xf32>
    %61 = vector.multi_reduction <maximumf>, %60, %cst_20 [2] : vector<1x8x8xf32> to vector<1x8xf32>
    %62 = vector.shape_cast %61 : vector<1x8xf32> to vector<1x8x1xf32>
    %63 = vector.broadcast %62 : vector<1x8x1xf32> to vector<1x8x8xf32>
    %64 = arith.subf %60, %63 : vector<1x8x8xf32>
    %65 = math.exp %64 : vector<1x8x8xf32>
    %cst_21 = arith.constant dense<0.000000e+00> : vector<1x8xf32>
    %66 = vector.multi_reduction <add>, %65, %cst_21 [2] : vector<1x8x8xf32> to vector<1x8xf32>
    %67 = vector.shape_cast %66 : vector<1x8xf32> to vector<1x8x1xf32>
    %68 = tpu.reciprocal %67 {approx = true} : vector<1x8x1xf32> -> vector<1x8x1xf32>
    %69 = vector.broadcast %68 : vector<1x8x1xf32> to vector<1x8x8xf32>
    %70 = arith.mulf %65, %69 : vector<1x8x8xf32>
    %71 = arith.truncf %70 : vector<1x8x8xf32> to vector<1x8x8xbf16>
    "tpu.trace_start"() <{level = 10 : i32, message = "bqk,bkd->bqd"}> : () -> ()
    %cst_22 = arith.constant dense<0.000000e+00> : vector<1x8x8xf32>
    %72 = tpu.matmul %71, %59, %cst_22 {dimension_numbers = #tpu.dot_dimension_numbers<[2], [1], [1], [2], [0, 0, 0, 1, 1, 2], [0], [0]>} : vector<1x8x8xbf16>, vector<1x8x8xbf16>, vector<1x8x8xf32> -> vector<1x8x8xf32>
    "tpu.trace_stop"() : () -> ()
    %73 = arith.truncf %72 : vector<1x8x8xf32> to vector<1x8x8xbf16>
    %74 = vector.extract_strided_slice %39 {offsets = [0, 0, 16], sizes = [1, 8, 8], strides = [1, 1, 1]} : vector<1x8x96xbf16> to vector<1x8x8xbf16>
    %75 = vector.extract_strided_slice %39 {offsets = [0, 0, 48], sizes = [1, 8, 8], strides = [1, 1, 1]} : vector<1x8x96xbf16> to vector<1x8x8xbf16>
    %76 = vector.extract_strided_slice %39 {offsets = [0, 0, 80], sizes = [1, 8, 8], strides = [1, 1, 1]} : vector<1x8x96xbf16> to vector<1x8x8xbf16>
    "tpu.trace_start"() <{level = 10 : i32, message = "bqd,bkd->bqk"}> : () -> ()
    %cst_23 = arith.constant dense<0.000000e+00> : vector<1x8x8xf32>
    %77 = tpu.matmul %74, %75, %cst_23 {dimension_numbers = #tpu.dot_dimension_numbers<[2], [2], [1], [1], [0, 0, 0, 1, 1, 1], [0], [0]>} : vector<1x8x8xbf16>, vector<1x8x8xbf16>, vector<1x8x8xf32> -> vector<1x8x8xf32>
    "tpu.trace_stop"() : () -> ()
    %cst_24 = arith.constant dense<0xFF800000> : vector<1x8xf32>
    %78 = vector.multi_reduction <maximumf>, %77, %cst_24 [2] : vector<1x8x8xf32> to vector<1x8xf32>
    %79 = vector.shape_cast %78 : vector<1x8xf32> to vector<1x8x1xf32>
    %80 = vector.broadcast %79 : vector<1x8x1xf32> to vector<1x8x8xf32>
    %81 = arith.subf %77, %80 : vector<1x8x8xf32>
    %82 = math.exp %81 : vector<1x8x8xf32>
    %cst_25 = arith.constant dense<0.000000e+00> : vector<1x8xf32>
    %83 = vector.multi_reduction <add>, %82, %cst_25 [2] : vector<1x8x8xf32> to vector<1x8xf32>
    %84 = vector.shape_cast %83 : vector<1x8xf32> to vector<1x8x1xf32>
    %85 = tpu.reciprocal %84 {approx = true} : vector<1x8x1xf32> -> vector<1x8x1xf32>
    %86 = vector.broadcast %85 : vector<1x8x1xf32> to vector<1x8x8xf32>
    %87 = arith.mulf %82, %86 : vector<1x8x8xf32>
    %88 = arith.truncf %87 : vector<1x8x8xf32> to vector<1x8x8xbf16>
    "tpu.trace_start"() <{level = 10 : i32, message = "bqk,bkd->bqd"}> : () -> ()
    %cst_26 = arith.constant dense<0.000000e+00> : vector<1x8x8xf32>
    %89 = tpu.matmul %88, %76, %cst_26 {dimension_numbers = #tpu.dot_dimension_numbers<[2], [1], [1], [2], [0, 0, 0, 1, 1, 2], [0], [0]>} : vector<1x8x8xbf16>, vector<1x8x8xbf16>, vector<1x8x8xf32> -> vector<1x8x8xf32>
    "tpu.trace_stop"() : () -> ()
    %90 = arith.truncf %89 : vector<1x8x8xf32> to vector<1x8x8xbf16>
    %91 = vector.extract_strided_slice %39 {offsets = [0, 0, 24], sizes = [1, 8, 8], strides = [1, 1, 1]} : vector<1x8x96xbf16> to vector<1x8x8xbf16>
    %92 = vector.extract_strided_slice %39 {offsets = [0, 0, 56], sizes = [1, 8, 8], strides = [1, 1, 1]} : vector<1x8x96xbf16> to vector<1x8x8xbf16>
    %93 = vector.extract_strided_slice %39 {offsets = [0, 0, 88], sizes = [1, 8, 8], strides = [1, 1, 1]} : vector<1x8x96xbf16> to vector<1x8x8xbf16>
    "tpu.trace_start"() <{level = 10 : i32, message = "bqd,bkd->bqk"}> : () -> ()
    %cst_27 = arith.constant dense<0.000000e+00> : vector<1x8x8xf32>
    %94 = tpu.matmul %91, %92, %cst_27 {dimension_numbers = #tpu.dot_dimension_numbers<[2], [2], [1], [1], [0, 0, 0, 1, 1, 1], [0], [0]>} : vector<1x8x8xbf16>, vector<1x8x8xbf16>, vector<1x8x8xf32> -> vector<1x8x8xf32>
    "tpu.trace_stop"() : () -> ()
    %cst_28 = arith.constant dense<0xFF800000> : vector<1x8xf32>
    %95 = vector.multi_reduction <maximumf>, %94, %cst_28 [2] : vector<1x8x8xf32> to vector<1x8xf32>
    %96 = vector.shape_cast %95 : vector<1x8xf32> to vector<1x8x1xf32>
    %97 = vector.broadcast %96 : vector<1x8x1xf32> to vector<1x8x8xf32>
    %98 = arith.subf %94, %97 : vector<1x8x8xf32>
    %99 = math.exp %98 : vector<1x8x8xf32>
    %cst_29 = arith.constant dense<0.000000e+00> : vector<1x8xf32>
    %100 = vector.multi_reduction <add>, %99, %cst_29 [2] : vector<1x8x8xf32> to vector<1x8xf32>
    %101 = vector.shape_cast %100 : vector<1x8xf32> to vector<1x8x1xf32>
    %102 = tpu.reciprocal %101 {approx = true} : vector<1x8x1xf32> -> vector<1x8x1xf32>
    %103 = vector.broadcast %102 : vector<1x8x1xf32> to vector<1x8x8xf32>
    %104 = arith.mulf %99, %103 : vector<1x8x8xf32>
    %105 = arith.truncf %104 : vector<1x8x8xf32> to vector<1x8x8xbf16>
    "tpu.trace_start"() <{level = 10 : i32, message = "bqk,bkd->bqd"}> : () -> ()
    %cst_30 = arith.constant dense<0.000000e+00> : vector<1x8x8xf32>
    %106 = tpu.matmul %105, %93, %cst_30 {dimension_numbers = #tpu.dot_dimension_numbers<[2], [1], [1], [2], [0, 0, 0, 1, 1, 2], [0], [0]>} : vector<1x8x8xbf16>, vector<1x8x8xbf16>, vector<1x8x8xf32> -> vector<1x8x8xf32>
    "tpu.trace_stop"() : () -> ()
    %107 = arith.truncf %106 : vector<1x8x8xf32> to vector<1x8x8xbf16>
    %108 = tpu.concatenate %56, %73, %90, %107 in 2 : vector<1x8x8xbf16>, vector<1x8x8xbf16>, vector<1x8x8xbf16>, vector<1x8x8xbf16> -> vector<1x8x32xbf16>
    %109 = vector.shape_cast %108 : vector<1x8x32xbf16> to vector<8x32xbf16>
    %c0_31 = arith.constant 0 : index
    %c0_32 = arith.constant 0 : index
    %110 = vector.load %arg5[%c0_31, %c0_32] : memref<32x32xbf16, #tpu.memory_space<vmem>>, vector<32x32xbf16>
    %cst_33 = arith.constant dense<0.000000e+00> : vector<8x32xf32>
    %111 = tpu.matmul %109, %110, %cst_33 {dimension_numbers = #tpu.dot_dimension_numbers<[1], [0], [0], [1], [0, 0, 1, 1], [], []>} : vector<8x32xbf16>, vector<32x32xbf16>, vector<8x32xf32> -> vector<8x32xf32>
    %112 = vector.broadcast %8 : vector<1x32xf32> to vector<8x32xf32>
    %113 = arith.addf %111, %112 : vector<8x32xf32>
    %114 = arith.addf %1, %113 : vector<8x32xf32>
    %cst_34 = arith.constant dense<0.000000e+00> : vector<8xf32>
    %115 = vector.multi_reduction <add>, %114, %cst_34 [1] : vector<8x32xf32> to vector<8xf32>
    %116 = vector.shape_cast %115 : vector<8xf32> to vector<8x1xf32>
    %cst_35 = arith.constant 3.200000e+01 : f32
    %117 = vector.broadcast %cst_35 : f32 to vector<8x1xf32>
    %118 = arith.divf %116, %117 : vector<8x1xf32>
    %119 = vector.broadcast %118 : vector<8x1xf32> to vector<8x32xf32>
    %120 = arith.subf %114, %119 : vector<8x32xf32>
    %121 = arith.mulf %120, %120 : vector<8x32xf32>
    %cst_36 = arith.constant dense<0.000000e+00> : vector<8xf32>
    %122 = vector.multi_reduction <add>, %121, %cst_36 [1] : vector<8x32xf32> to vector<8xf32>
    %123 = vector.shape_cast %122 : vector<8xf32> to vector<8x1xf32>
    %cst_37 = arith.constant 3.200000e+01 : f32
    %124 = vector.broadcast %cst_37 : f32 to vector<8x1xf32>
    %125 = arith.divf %123, %124 : vector<8x1xf32>
    %126 = vector.broadcast %118 : vector<8x1xf32> to vector<8x32xf32>
    %127 = arith.subf %114, %126 : vector<8x32xf32>
    %cst_38 = arith.constant 9.99999997E-7 : f32
    %128 = vector.broadcast %cst_38 : f32 to vector<8x1xf32>
    %129 = arith.addf %125, %128 : vector<8x1xf32>
    %130 = math.rsqrt %129 : vector<8x1xf32>
    %131 = vector.broadcast %130 : vector<8x1xf32> to vector<8x32xf32>
    %132 = arith.mulf %127, %131 : vector<8x32xf32>
    %133 = vector.broadcast %5 : vector<1x32xf32> to vector<8x32xf32>
    %134 = arith.mulf %132, %133 : vector<8x32xf32>
    %135 = vector.broadcast %6 : vector<1x32xf32> to vector<8x32xf32>
    %136 = arith.addf %134, %135 : vector<8x32xf32>
    %137 = arith.truncf %136 : vector<8x32xf32> to vector<8x32xbf16>
    %c0_39 = arith.constant 0 : index
    %c0_40 = arith.constant 0 : index
    %138 = vector.load %arg7[%c0_39, %c0_40] : memref<32x512xbf16, #tpu.memory_space<vmem>>, vector<32x512xbf16>
    %cst_41 = arith.constant dense<0.000000e+00> : vector<8x512xf32>
    %139 = tpu.matmul %137, %138, %cst_41 {dimension_numbers = #tpu.dot_dimension_numbers<[1], [0], [0], [1], [0, 0, 1, 1], [], []>} : vector<8x32xbf16>, vector<32x512xbf16>, vector<8x512xf32> -> vector<8x512xf32>
    %c0_42 = arith.constant 0 : index
    %c0_43 = arith.constant 0 : index
    %140 = vector.load %arg8[%c0_42, %c0_43] : memref<1x512xf32, #tpu.memory_space<vmem>>, vector<1x512xf32>
    %141 = vector.broadcast %140 : vector<1x512xf32> to vector<8x512xf32>
    %142 = arith.addf %139, %141 : vector<8x512xf32>
    %cst_44 = arith.constant 0.000000e+00 : f32
    %143 = vector.broadcast %cst_44 : f32 to vector<8x512xf32>
    %144 = arith.maximumf %142, %143 : vector<8x512xf32>
    %145 = arith.truncf %144 : vector<8x512xf32> to vector<8x512xbf16>
    %c0_45 = arith.constant 0 : index
    %c0_46 = arith.constant 0 : index
    %146 = vector.load %arg9[%c0_45, %c0_46] : memref<512x32xbf16, #tpu.memory_space<vmem>>, vector<512x32xbf16>
    %cst_47 = arith.constant dense<0.000000e+00> : vector<8x32xf32>
    %147 = tpu.matmul %145, %146, %cst_47 {dimension_numbers = #tpu.dot_dimension_numbers<[1], [0], [0], [1], [0, 0, 1, 1], [], []>} : vector<8x512xbf16>, vector<512x32xbf16>, vector<8x32xf32> -> vector<8x32xf32>
    %148 = vector.broadcast %9 : vector<1x32xf32> to vector<8x32xf32>
    %149 = arith.addf %147, %148 : vector<8x32xf32>
    %150 = arith.addf %114, %149 : vector<8x32xf32>
    %151 = vector.shape_cast %150 : vector<8x32xf32> to vector<1x8x32xf32>
    %c0_48 = arith.constant 0 : index
    %c0_49 = arith.constant 0 : index
    %c0_50 = arith.constant 0 : index
    %152 = vector.load %arg10[%c0_48, %c0_49, %c0_50] : memref<1x8x32xf32, #tpu.memory_space<vmem>>, vector<1x8x32xf32>
    tpu.vector_store %arg10[%c0_48, %c0_49, %c0_50], %151 {strides = array<i32>} : memref<1x8x32xf32, #tpu.memory_space<vmem>>, vector<1x8x32xf32>,
    return
  }
  func.func @transform_0(%arg0: i32) -> (i32, i32, i32) {
    %c0_i32 = arith.constant 0 : i32
    %c0_i32_0 = arith.constant 0 : i32
    %c0_i32_1 = arith.constant 0 : i32
    return %arg0, %c0_i32, %c0_i32_0 : i32, i32, i32
  }
  func.func @transform_1(%arg0: i32) -> (i32, i32) {
    %c0_i32 = arith.constant 0 : i32
    %c0_i32_0 = arith.constant 0 : i32
    %c0_i32_1 = arith.constant 0 : i32
    return %c0_i32, %c0_i32_0 : i32, i32
  }
  func.func @transform_2(%arg0: i32) -> (i32, i32) {
    %c0_i32 = arith.constant 0 : i32
    %c0_i32_0 = arith.constant 0 : i32
    %c0_i32_1 = arith.constant 0 : i32
    return %c0_i32, %c0_i32_0 : i32, i32
  }
  func.func @transform_3(%arg0: i32) -> (i32, i32) {
    %c0_i32 = arith.constant 0 : i32
    %c0_i32_0 = arith.constant 0 : i32
    %c0_i32_1 = arith.constant 0 : i32
    return %c0_i32, %c0_i32_0 : i32, i32
  }
  func.func @transform_4(%arg0: i32) -> (i32, i32) {
    %c0_i32 = arith.constant 0 : i32
    %c0_i32_0 = arith.constant 0 : i32
    %c0_i32_1 = arith.constant 0 : i32
    return %c0_i32, %c0_i32_0 : i32, i32
  }
  func.func @transform_5(%arg0: i32) -> (i32, i32) {
    %c0_i32 = arith.constant 0 : i32
    %c0_i32_0 = arith.constant 0 : i32
    %c0_i32_1 = arith.constant 0 : i32
    return %c0_i32, %c0_i32_0 : i32, i32
  }
  func.func @transform_6(%arg0: i32) -> (i32, i32) {
    %c0_i32 = arith.constant 0 : i32
    %c0_i32_0 = arith.constant 0 : i32
    %c0_i32_1 = arith.constant 0 : i32
    return %c0_i32, %c0_i32_0 : i32, i32
  }
  func.func @transform_7(%arg0: i32) -> (i32, i32) {
    %c0_i32 = arith.constant 0 : i32
    %c0_i32_0 = arith.constant 0 : i32
    %c0_i32_1 = arith.constant 0 : i32
    return %c0_i32, %c0_i32_0 : i32, i32
  }
  func.func @transform_8(%arg0: i32) -> (i32, i32) {
    %c0_i32 = arith.constant 0 : i32
    %c0_i32_0 = arith.constant 0 : i32
    %c0_i32_1 = arith.constant 0 : i32
    return %c0_i32, %c0_i32_0 : i32, i32
  }
  func.func @transform_9(%arg0: i32) -> (i32, i32, i32) {
    %c0_i32 = arith.constant 0 : i32
    %c0_i32_0 = arith.constant 0 : i32
    %c0_i32_1 = arith.constant 0 : i32
    return %arg0, %c0_i32, %c0_i32_0 : i32, i32, i32
  }
}

</mosaic_0001>

<bundles_post_ra>
// kernel: tpu_custom_call.1
= control target key start
LH: loop header
LB: loop body
LE: loop exit
PB: predicated region body
PF: predicated region fallthrough
CT: control target
= control target key end

     0   :  { %14 = vsyncpa [#allocation3], 0  ;;  %s1996_s0 = inlined_call_operand.vmem [shape: f32[2,8,32], index: 0, kind: input, shape index: {}]   ;;  %s1997_s1 = inlined_call_operand.vmem [shape: f32[4,32], index: 1, kind: input, shape index: {}]   ;;  %s1998_s2 = inlined_call_operand.vmem [shape: bf16[32,96], index: 2, kind: input, shape index: {}]   ;;  %s1999_s3 = inlined_call_operand.vmem [shape: f32[1,96], index: 3, kind: input, shape index: {}]   ;;  %s2000_s4 = inlined_call_operand.vmem [shape: bf16[32,32], index: 4, kind: input, shape index: {}]   ;;  %s2001_s5 = inlined_call_operand.vmem [shape: f32[2,32], index: 5, kind: input, shape index: {}]   ;;  %s2002_s6 = inlined_call_operand.vmem [shape: bf16[32,512], index: 6, kind: input, shape index: {}]   ;;  %s2003_s7 = inlined_call_operand.vmem [shape: f32[1,512], index: 7, kind: input, shape index: {}]   ;;  %s2004_s8 = inlined_call_operand.vmem [shape: bf16[512,32], index: 8, kind: input, shape index: {}]   ;;  %s2005_s9 = inlined_call_operand.hbm [shape: f32[2,8,32], index: 9, kind: output, shape index: {}]  }
   0x1   :  { %16 = vsyncpa [#allocation3 + $0x1], 0  ;;  %s1676_s30 = smov 0   ;;  %s1678_s10 = smov 0  }
   0x2   :  { %s1680_s11 = smov 0   ;;  %s1682_s12 = smov 0  }
   0x3 LB: > { %s1697_s13 = sadd.s32 4294967295, %s1609_s12   ;;  %s1226_s14 = sadd.s32 4294967294, %s1609_s12   ;;  %s1609_s12 = sphi %s1682_s12, %s2011_s12   ;;  %s1605_s11 = sphi %s1680_s11, %s2010_s11   ;;  %s1601_s10 = sphi %s1678_s10, %s2009_s10   ;;  %s1597_s30 = sphi %s1676_s30, %s2008_s30  }
   0x4   : > { %s1701_s15 = sadd.s32 1, %s1609_s12   ;;  %s223_s16 = sadd.s32 1, %s1605_s11 }
   0x5   : > { %s220_s17 = ssub.s32 %s1609_s12, %s1701_s15  ;;  %p233_p0 = scmp.ne.s32.totalorder %s1605_s11, %s1601_s10 }
   0x6   : > { %p221_p1 = scmp.eq.s32.totalorder %s220_s17, 0  ;;  %p234_p2 = scmp.eq.s32.totalorder %s1697_s13, 1 }
   0x7   : > { %p239_p3 = scmp.ne.s32.totalorder %s1601_s10, %s1597_s30  ;;  %p240_p4 = scmp.eq.s32.totalorder %s1226_s14, 1 }
   0x8   : > { %s1712_s18 = scalar_select %p221_p1, %s1605_s11, %s223_s16  }
   0x9   : > { %p1714_p5 = por %p234_p2, %p233_p0  ;;  %p1718_p6 = por %p240_p4, %p239_p3 }
   0xa   : > { %p1229_p7 = scmp.ge.s32.totalorder %s1609_s12, 1  ;;  %p289_p8 = scmp.lt.s32.totalorder %s1609_s12, 3 }
   0xc   : > { %p290_p9 = pnand %p1229_p7, %p289_p8 }
   0xd   : > { %p324_p10 = scmp.lt.s32.totalorder (!%p290_p9), %s1697_s13, 1  ;;  %s1613_s23 = smov (!%p290_p9), 120  }
   0xe   : > { %293 = sbr.rel (%p290_p9) target bundleno = 1901 (0x76d), region = 56  ;;  %s1614_s24 = smov (!%p290_p9), 96  }
   0xf   : > { %s1616_s26 = smov (!%p290_p9), 88   ;;  %s1617_s27 = smov (!%p290_p9), 112  }
  0x10   : > { %s1618_s28 = smov (!%p290_p9), 80   ;;  %s1619_s29 = smov (!%p290_p9), 64  }
  0x11   : > { %s1620_s14 = smov (!%p290_p9), 56   ;;  %s1621_s16 = smov (!%p290_p9), 40  }
  0x12   : > { %s1622_s17 = smov (!%p290_p9), 48  }
  0x13   : > { %s325_s21 = scalar_select %p324_p10, %s1697_s13, 1  ;;  %vm332_vm0 = vcmask 261120   ;;  %v1611_v2 = vmov 32.0   ;;  %v1427_v14 = vld [vmem:[%s1998_s2 + $0x8] sm:$0xff]  ;;  %v1426_v15 = vld [vmem:[%s1998_s2] sm:$0xff]  ;;  %vm409_vm5 = vcmask 64512  }
  0x14   : > { %1525 = vrcp.f32 %v1611_v2  ;;  %396 = vmatpush.bf16.msra.mxu0 %v1427_v14  ;;  %v1748_v24 = vld [vmem:[%s1997_s1] sm:$0xf]  ;;  %vm446_vm6 = vcmask 1043456   ;;  %vm653_vm7 = vcmask 130048   ;;  %vm656_vm8 = vcmask 195584  }
  0x15   : > { %s1231_s22 = sshll.u32 %s325_s21, 3  ;;  %v362_v26 = vperm.slane %v1748_v24, 0  ;;  %v364_v29 = vperm.slane %v1748_v24, 1  ;;  %v1524_v33 = vld [vmem:[%s1999_s3] ss:$0 sm:$0xff]  ;;  %s1623_s21 = smov 8  }
  0x16   : > { %s327_s25 = scalar_lea.vmem %s1996_s0, %s1231_s22  ;;  %s1612_s22 = smov 104  }
  0x17   : > { %v1729_v0 = vld [vmem:[%s327_s25] sm:$0xff]  ;;  %s1615_s25 = smov 72  }
  0x18   : > { %v333_v1 = vsel %vm332_vm0, %v1729_v0, 0.0  ;;  %397 = vmatpush.bf16.msra.mxu0 %v1426_v15 }
  0x19   : > { %334 = vadd.xlane.f32.xlu0 %v333_v1 }
  0x1a   : > { %v1526_v3 = vpop.eup %1525 }
  0x1b   : > { %v337_v4 = vmul.f32 32.0, %v1526_v3  ;;  %vm341_vm1 = vweird.f32 %v1526_v3 }
  0x1d   : > { %v338_v5 = vsub.f32 1.0, %v337_v4 }
  0x1f   : > { %v339_v6 = vmul.f32 %v1526_v3, %v338_v5 }
  0x21   : > { %v340_v7 = vadd.f32 %v1526_v3, %v339_v6 }
  0x23   : > { %v1733_v8 = vsel %vm341_vm1, %v1526_v3, %v340_v7 }
  0x8c   : > { %v335_v9 = vpop.xlane.xlu0 %334 }
  0x8d   : > { %v343_v10 = vmul.f32 %v1733_v8, %v335_v9 }
  0x8f   : > { %v344_v11 = vsub.f32 %v1729_v0, %v343_v10 }
  0x91   : > { %v345_v12 = vmul.f32 %v344_v11, %v344_v11 }
  0x93   : > { %v346_v13 = vsel %vm332_vm0, %v345_v12, 0.0 }
  0x94   : > { %347 = vadd.xlane.f32.xlu0 %v346_v13 }
 0x107   : > { %v348_v16 = vpop.xlane.xlu0 %347 }
 0x108   : > { %v349_v17 = vmul.f32 %v348_v16, %v1733_v8 }
 0x10a   : > { %v350_v18 = vadd.f32 1e-06, %v349_v17 }
 0x10c   : > { %1527 = vrsqrt.f32 %v350_v18  ;;  %vm357_vm3 = vweird.f32 %v350_v18 }
 0x112   : > { %v1528_v19 = vpop.eup %1527 }
 0x113   : > { %v352_v20 = vmul.f32 %v1528_v19, %v350_v18  ;;  %vm358_vm2 = vweird.f32 %v1528_v19 }
 0x114   : > { %vm359_vm4 = vmor %vm357_vm3, %vm358_vm2 }
 0x115   : > { %v353_v21 = vmul.f32 %v1528_v19, %v352_v20 }
 0x117   : > { %v354_v22 = vmul.f32 0.5, %v353_v21 }
 0x119   : > { %v355_v23 = vsub.f32 1.5, %v354_v22 }
 0x11b   : > { %v356_v25 = vmul.f32 %v1528_v19, %v355_v23 }
 0x11d   : > { %v360_v27 = vsel %vm359_vm4, %v1528_v19, %v356_v25 }
 0x11e   : > { %v361_v28 = vmul.f32 %v360_v27, %v344_v11 }
 0x120   : > { %v363_v30 = vmul.f32 %v362_v26, %v361_v28 }
 0x122   : > { %v365_v31 = vadd.f32 %v364_v29, %v363_v30 }
 0x124   : > { %v366_v32 = vpack.c.bf16 %v365_v31, %v365_v31 }
 0x126   : > { %1240 = vmatmul.msk.bf16.vlgmr.msra.gmra.mxu0 %vm332_vm0, %v366_v32 }
 0x1a3   : > { %v399_v34 = vpop.f32.mrf.mxu0 }
 0x1a4   : > { %v400_v35 = vadd.f32 %v1524_v33, %v399_v34 }
 0x1a6   : > { %v403_v36 = vpack.c.bf16 %v400_v35, %v400_v35 }
 0x1a8   : > { %v405_v37 = vunpack.c.l.b16 %v403_v36 }
 0x1aa   : > { %v406_v38 = vpack.c.b16 %v405_v37, %v405_v37 }
 0x1ab   : > { %v401_v39 = vpop.f32.mrf.mxu0 }
 0x1ac   : > { %578 = vrot.lane.b32.xlu0 %v406_v38, %s1612_s22  ;;  %464 = vrot.lane.b32.xlu2 %v406_v38, %s1613_s23  ;;  %s1624_s22 = smov 24   ;;  %s1625_s23 = smov 16  }
 0x1ad   : > { %407 = vrot.lane.b32.xlu1 %v406_v38, %s1614_s24 }
 0x1b4   : > { %580 = vrot.lane.b32.xlu2 %v406_v38, %s1615_s25 }
 0x1b5   : > { %466 = vrot.lane.b32.xlu1 %v406_v38, %s1616_s26 }
 0x1bc   : > { %521 = vrot.lane.b32.xlu2 %v406_v38, %s1617_s27 }
 0x1bd   : > { %523 = vrot.lane.b32.xlu1 %v406_v38, %s1618_s28 }
 0x206   : > { %v465_v40 = vpop.permute.xlu2 %464 }
 0x20e   : > { %v581_v43 = vpop.permute.xlu2 %580 }
 0x20f   : > { %v586_v46 = vsel %vm409_vm5, %v581_v43, 0 }
 0x216   : > { %v522_v49 = vpop.permute.xlu2 %521 }
 0x21e   : > { %v579_v50 = vpop.permute.xlu0 %578 }
 0x21f   : > { %v408_v41 = vpop.permute.xlu1 %407 }
 0x220   : > { %v414_v42 = vsel %vm409_vm5, %v408_v41, 0 }
 0x221   : > { %423 = vmatpush.bf16.xpose.msra.mxu1 %v414_v42 }
 0x227   : > { %v467_v44 = vpop.permute.xlu1 %466 }
 0x228   : > { %1241 = vmatmul.msk.bf16.vlgmr.msra.gmra.mxu1 %vm409_vm5, %v403_v36  ;;  %v472_v45 = vsel %vm409_vm5, %v467_v44, 0 }
 0x229   : > { %481 = vmatpush.bf16.xpose.msra.mxu3 %v472_v45 }
 0x22f   : > { %v524_v47 = vpop.permute.xlu1 %523 }
 0x230   : > { %1243 = vmatmul.msk.bf16.vlgmr.msra.gmra.mxu3 %vm409_vm5, %v465_v40  ;;  %v529_v48 = vsel %vm409_vm5, %v524_v47, 0 }
 0x231   : > { %595 = vmatpush.bf16.xpose.msrb.mxu3 %v586_v46  ;;  %538 = vmatpush.bf16.xpose.msrb.mxu0 %v529_v48 }
 0x238   : > { %1245 = vmatmul.msk.bf16.vlgmr.msrb.gmra.mxu0 %vm409_vm5, %v522_v49 }
 0x240   : > { %1247 = vmatmul.msk.bf16.vlgmr.msrb.gmra.mxu3 %vm409_vm5, %v579_v50 }
 0x2a5   : > { %v425_v51 = vpop.f32.mrf.mxu1 }
 0x2a6   : > { %v429_v52 = vsel %vm409_vm5, %v425_v51, -inf }
 0x2a7   : > { %430 = vmax.xlane.f32.xlu1 %v429_v52 }
 0x2ad   : > { %v427_v53 = vpop.f32.mrf.mxu1 }
 0x2b3   : > { %v483_v54 = vpop.f32.mrf.mxu3 }
 0x2b4   : > { %v487_v55 = vsel %vm409_vm5, %v483_v54, -inf }
 0x2b5   : > { %488 = vmax.xlane.f32.xlu2 %v487_v55  ;;  %v540_v56 = vpop.f32.mrf.mxu0 }
 0x2b6   : > { %v544_v58 = vsel %vm409_vm5, %v540_v56, -inf }
 0x2bb   : > { %v485_v57 = vpop.f32.mrf.mxu3 }
 0x2bd   : > { %545 = vmax.xlane.f32.xlu2 %v544_v58  ;;  %v542_v59 = vpop.f32.mrf.mxu0 }
 0x2c3   : > { %v597_v60 = vpop.f32.mrf.mxu3 }
 0x2c4   : > { %v601_v61 = vsel %vm409_vm5, %v597_v60, -inf }
 0x2c5   : > { %602 = vmax.xlane.f32.xlu0 %v601_v61 }
 0x2cb   : > { %v599_v62 = vpop.f32.mrf.mxu3 }
 0x2d5   : > { %441 = vrot.lane.b32.xlu2 %v406_v38, %s1619_s29 }
 0x2d9   : > { %499 = vrot.lane.b32.xlu0 %v406_v38, %s1620_s14 }
 0x2dd   : > { %613 = vrot.lane.b32.xlu2 %v406_v38, %s1621_s16 }
 0x2e1   : > { %556 = vrot.lane.b32.xlu0 %v406_v38, %s1622_s17  ;;  %s321_s17 = sand.u32 1, %s1601_s10  }
 0x31a   : > { %v431_v63 = vpop.xlane.xlu1 %430 }
 0x31b   : > { %v432_v1 = vsub.f32 %v425_v51, %v431_v63  ;;  %v1429_v63 = vld [vmem:[%s2000_s4 + $0x8] sm:$0xff] }
 0x31c   : > { %684 = vmatpush.bf16.msra.mxu0 %v1429_v63  ;;  %v1450_v63 = vld [vmem:[%s2004_s8 + $0x60] sm:$0xff] }
 0x31d   : > { %v433_v2 = vmul.f32 1.442695, %v432_v1  ;;  %v1428_v1 = vld [vmem:[%s2000_s4] sm:$0xff] }
 0x31f   : > { %1529 = vpow2.f32 %v433_v2 }
 0x320   : > { %685 = vmatpush.bf16.msra.mxu0 %v1428_v1  ;;  %v1458_v1 = vld [vmem:[%s2004_s8 + $0xa0] sm:$0xff] }
 0x325   : > { %v1530_v3 = vpop.eup %1529 }
 0x326   : > { %v435_v4 = vsel %vm409_vm5, %v1530_v3, 0.0 }
 0x327   : > { %436 = vadd.xlane.f32.xlu1 %v435_v4 }
 0x328   : > { %v489_v5 = vpop.xlane.xlu2 %488 }
 0x329   : > { %v490_v6 = vsub.f32 %v483_v54, %v489_v5 }
 0x32b   : > { %v491_v7 = vmul.f32 1.442695, %v490_v6 }
 0x32d   : > { %1531 = vpow2.f32 %v491_v7 }
 0x330   : > { %v546_v9 = vpop.xlane.xlu2 %545 }
 0x331   : > { %v547_v16 = vsub.f32 %v540_v56, %v546_v9 }
 0x333   : > { %v1532_v10 = vpop.eup %1531  ;;  %v548_v18 = vmul.f32 1.442695, %v547_v16 }
 0x334   : > { %v493_v11 = vsel %vm409_vm5, %v1532_v10, 0.0 }
 0x335   : > { %494 = vadd.xlane.f32.xlu1 %v493_v11 }
 0x338   : > { %v603_v12 = vpop.xlane.xlu0 %602  ;;  %v442_v13 = vpop.permute.xlu2 %441 }
 0x339   : > { %v604_v14 = vsub.f32 %v597_v60, %v603_v12  ;;  %v448_v15 = vsel %vm446_vm6, %v442_v13, 0 }
 0x33a   : > { %457 = vmatpush.bf16.msra.mxu2 %v448_v15 }
 0x33b   : > { %v605_v17 = vmul.f32 1.442695, %v604_v14 }
 0x33d   : > { %1533 = vpow2.f32 %v605_v17 }
 0x33e   : > { %1535 = vpow2.f32 %v548_v18 }
 0x340   : > { %v614_v31 = vpop.permute.xlu2 %613 }
 0x341   : > { %v619_v33 = vsel %vm446_vm6, %v614_v31, 0  ;;  %v1435_v31 = vld [vmem:[%s2002_s6 + $0x2c] sm:$0xf] }
 0x343   : > { %v1534_v19 = vpop.eup %1533 }
 0x344   : > { %v607_v20 = vsel %vm409_vm5, %v1534_v19, 0.0  ;;  %v1536_v21 = vpop.eup %1535 }
 0x345   : > { %608 = vadd.xlane.f32.xlu1 %v607_v20  ;;  %v550_v25 = vsel %vm409_vm5, %v1536_v21, 0.0 }
 0x34b   : > { %v500_v22 = vpop.permute.xlu0 %499 }
 0x34c   : > { %v505_v23 = vsel %vm446_vm6, %v500_v22, 0  ;;  %v1278_v22 = vld [vmem:[%s2002_s6 + $0x30] sm:$0xf0] }
 0x34d   : > { %514 = vmatpush.bf16.msrb.mxu2 %v505_v23  ;;  %551 = vadd.xlane.f32.xlu1 %v550_v25  ;;  %v1284_v23 = vld [vmem:[%s2002_s6 + $0x28] sm:$0xf] }
 0x353   : > { %v557_v26 = vpop.permute.xlu0 %556 }
 0x354   : > { %v562_v27 = vsel %vm446_vm6, %v557_v26, 0  ;;  %v1437_v26 = vld [vmem:[%s2002_s6 + $0x34] sm:$0xf0] }
 0x355   : > { %571 = vmatpush.bf16.msrb.mxu1 %v562_v27  ;;  %v1276_v27 = vld [vmem:[%s2002_s6 + $0x20] sm:$0xf] }
 0x39a   : > { %v437_v28 = vpop.xlane.xlu1 %436 }
 0x39b   : > { %1537 = vrcp.f32 %v437_v28  ;;  %v1436_v28 = vld [vmem:[%s2002_s6 + $0x2c] sm:$0xf0] }
 0x3a1   : > { %v1538_v29 = vpop.eup %1537 }
 0x3a2   : > { %v439_v30 = vmul.f32 %v1538_v29, %v1530_v3  ;;  %v1285_v29 = vor.u32 %v1437_v26, %v1284_v23  ;;  %v1439_v23 = vld [vmem:[%s2004_s8 + $0x8] sm:$0xff]  ;;  %v1438_v26 = vld [vmem:[%s2004_s8] sm:$0xff] }
 0x3a4   : > { %v440_v32 = vpack.c.bf16 %v439_v30, %v439_v30  ;;  %v1277_v30 = vor.u32 %v1436_v28, %v1276_v27  ;;  %v1462_v27 = vld [vmem:[%s2004_s8 + $0xc0] sm:$0xff]  ;;  %v1447_v28 = vld [vmem:[%s2004_s8 + $0x48] sm:$0xff] }
 0x3a6   : > { %1242 = vmatmul.msk.bf16.vlgmr.msra.gmra.mxu2 %vm409_vm5, %v440_v32  ;;  %v1286_v32 = vld [vmem:[%s2002_s6 + $0x38] sm:$0xf0]  ;;  %786 = vmatpush.bf16.msra.mxu1 %v1277_v30  ;;  %v1446_v30 = vld [vmem:[%s2004_s8 + $0x40] sm:$0xff] }
 0x3a7   : > { %628 = vmatpush.bf16.msra.mxu2 %v619_v33  ;;  %v1430_v33 = vld [vmem:[%s2002_s6 + $0x4] sm:$0xf] }
 0x3a8   : > { %v495_v34 = vpop.xlane.xlu1 %494 }
 0x3a9   : > { %1539 = vrcp.f32 %v495_v34  ;;  %v1262_v34 = vld [vmem:[%s2002_s6 + $0x10] sm:$0xf0] }
 0x3af   : > { %v1540_v35 = vpop.eup %1539 }
 0x3b0   : > { %v497_v36 = vmul.f32 %v1540_v35, %v1532_v10  ;;  %v1791_v10 = vld [vmem:[%s2001_s5] sm:$0x3]  ;;  %v1289_v35 = vor.u32 %v1435_v31, %v1286_v32 }
 0x3b1   : > { %v663_v11 = vperm.slane %v1791_v10, 0  ;;  %v1454_v31 = vld [vmem:[%s2004_s8 + $0x80] sm:$0xff] }
 0x3b2   : > { %v498_v37 = vpack.c.bf16 %v497_v36, %v497_v36  ;;  %v1268_v36 = vld [vmem:[%s2002_s6 + $0x8] sm:$0xf]  ;;  %825 = vmatpush.bf16.msrb.mxu0 %v1289_v35  ;;  %v727_v32 = vld [vmem:[%s2003_s7] sm:$0xf] }
 0x3b6   : > { %1244 = vmatmul.msk.bf16.vlgmr.msrb.gmra.mxu2 %vm409_vm5, %v498_v37  ;;  %v1265_v37 = vor.u32 %v1430_v33, %v1262_v34  ;;  %v729_v33 = vperm.slane %v727_v32, 0  ;;  %v732_v34 = vperm.slane %v727_v32, 3 }
 0x3b7   : > { %812 = vmatpush.bf16.msrb.mxu2 %v1285_v29  ;;  %v1455_v29 = vld [vmem:[%s2004_s8 + $0x88] sm:$0xff] }
 0x3b8   : > { %v609_v38 = vpop.xlane.xlu1 %608 }
 0x3b9   : > { %1541 = vrcp.f32 %v609_v38  ;;  %v1433_v38 = vld [vmem:[%s2002_s6 + $0x14] sm:$0xf0] }
 0x3bf   : > { %v1542_v39 = vpop.eup %1541 }
 0x3c0   : > { %v611_v40 = vmul.f32 %v1542_v39, %v1534_v19  ;;  %v552_v41 = vpop.xlane.xlu1 %551  ;;  %v1260_v39 = vld [vmem:[%s2002_s6] sm:$0xf] }
 0x3c1   : > { %1543 = vrcp.f32 %v552_v41  ;;  %v1269_v41 = vor.u32 %v1433_v38, %v1268_v36 }
 0x3c2   : > { %v612_v42 = vpack.c.bf16 %v611_v40, %v611_v40  ;;  %v1432_v40 = vld [vmem:[%s2002_s6 + $0xc] sm:$0xf0] }
 0x3c3   : > { %813 = vmatpush.bf16.msrb.mxu2 %v1269_v41 }
 0x3c6   : > { %1248 = vmatmul.msk.bf16.vlgmr.msra.gmra.mxu2 %vm409_vm5, %v612_v42  ;;  %v1261_v42 = vor.u32 %v1432_v40, %v1260_v39  ;;  %v730_v40 = vperm.slane %v727_v32, 1 }
 0x3c7   : > { %v1544_v43 = vpop.eup %1543 }
 0x3c8   : > { %v554_v44 = vmul.f32 %v1544_v43, %v1536_v21  ;;  %v1431_v43 = vld [vmem:[%s2002_s6 + $0xc] sm:$0xf]  ;;  %787 = vmatpush.bf16.msra.mxu1 %v1261_v42  ;;  %v731_v42 = vperm.slane %v727_v32, 2 }
 0x3ca   : > { %v555_v45 = vpack.c.bf16 %v554_v44, %v554_v44  ;;  %v1270_v44 = vld [vmem:[%s2002_s6 + $0x18] sm:$0xf0] }
 0x3cc   : > { %1246 = vmatmul.msk.bf16.vlgmr.msrb.gmra.mxu1 %vm409_vm5, %v555_v45  ;;  %v1273_v45 = vor.u32 %v1431_v43, %v1270_v44 }
 0x3ce   : > { %826 = vmatpush.bf16.msrb.mxu0 %v1273_v45 }
 0x429   : > { %v459_v46 = vpop.f32.mrf.mxu2 }
 0x42a   : > { %v463_v3 = vpack.c.bf16 %v459_v46, %v459_v46 }
 0x431   : > { %v461_v47 = vpop.f32.mrf.mxu2 }
 0x432   : > { %v1445_v47 = vld [vmem:[%s2004_s8 + $0x38] sm:$0xff] }
 0x433   : > { %1097 = vmatpush.bf16.msrb.mxu1 %v1445_v47 }
 0x439   : > { %v516_v48 = vpop.f32.mrf.mxu2 }
 0x43a   : > { %v520_v49 = vpack.c.bf16 %v516_v48, %v516_v48  ;;  %v1469_v48 = vld [vmem:[%s2004_s8 + $0xf8] sm:$0xff] }
 0x43c   : > { %v636_v50 = vunpack.c.l.b16 %v520_v49 }
 0x43e   : > { %v637_v51 = vpack.c.b16 %v636_v50, %v636_v50  ;;  %v1453_v50 = vld [vmem:[%s2004_s8 + $0x78] sm:$0xff] }
 0x440   : > { %638 = vrot.lane.b32.xlu1 %v637_v51, %s1623_s21  ;;  %v1461_v51 = vld [vmem:[%s2004_s8 + $0xb8] sm:$0xff]  ;;  %s1230_s21 = sshll.u32 %s321_s17, 3 }
 0x441   : > { %v518_v52 = vpop.f32.mrf.mxu2  ;;  %1123 = vmatpush.bf16.msra.mxu2 %v1461_v51  ;;  %s323_s26 = scalar_lea.vmem [#allocation2], %s1230_s21 }
 0x442   : > { %v1444_v52 = vld [vmem:[%s2004_s8 + $0x30] sm:$0xff]  ;;  %s1164_s27 = sshll.u32 %s323_s26, 4  ;;  %s1165_s27 = int_to_ptr.vmem [resolvable:$true] %s1164_s27 }
 0x443   : > { %1098 = vmatpush.bf16.msrb.mxu1 %v1444_v52 }
 0x449   : > { %v573_v53 = vpop.f32.mrf.mxu1  ;;  %v630_v54 = vpop.f32.mrf.mxu2 }
 0x44a   : > { %v577_v55 = vpack.c.bf16 %v573_v53, %v573_v53  ;;  %v634_v56 = vpack.c.bf16 %v630_v54, %v630_v54  ;;  %v1468_v53 = vld [vmem:[%s2004_s8 + $0xf0] sm:$0xff] }
 0x44c   : > { %v641_v57 = vunpack.c.l.b16 %v577_v55  ;;  %v646_v58 = vunpack.c.l.b16 %v634_v56  ;;  %v1460_v55 = vld [vmem:[%s2004_s8 + $0xb0] sm:$0xff]  ;;  %v1443_v56 = vld [vmem:[%s2004_s8 + $0x28] sm:$0xff] }
 0x44d   : > { %1124 = vmatpush.bf16.msra.mxu2 %v1460_v55  ;;  %1099 = vmatpush.bf16.msrb.mxu1 %v1443_v56 }
 0x44e   : > { %v642_v59 = vpack.c.b16 %v641_v57, %v641_v57  ;;  %v647_v60 = vpack.c.b16 %v646_v58, %v646_v58  ;;  %v1467_v57 = vld [vmem:[%s2004_s8 + $0xe8] sm:$0xff] }
 0x44f   : > { %v1451_v58 = vld [vmem:[%s2004_s8 + $0x68] sm:$0xff] }
 0x450   : > { %648 = vrot.lane.b32.xlu0 %v647_v60, %s1624_s22  ;;  %643 = vrot.lane.b32.xlu2 %v642_v59, %s1625_s23  ;;  %v1459_v59 = vld [vmem:[%s2004_s8 + $0xa8] sm:$0xff]  ;;  %v1442_v60 = vld [vmem:[%s2004_s8 + $0x20] sm:$0xff]  ;;  %s1423_s22 = sshll.u32 %s1697_s13, 3  ;;  %s1152_s13 = scalar_lea.sflag [#allocation3], %s321_s17 }
 0x451   : > { %v575_v61 = vpop.f32.mrf.mxu1  ;;  %v632_v62 = vpop.f32.mrf.mxu2  ;;  %1125 = vmatpush.bf16.msra.mxu2 %v1459_v59  ;;  %1100 = vmatpush.bf16.msrb.mxu1 %v1442_v60  ;;  %s1162_s25 = scalar_lea.hbm %s2005_s9, %s1423_s22  ;;  %s1567_s22 = scalar_lea.hbm %s2005_s9, 16 }
 0x452   : > { %v1466_v61 = vld [vmem:[%s2004_s8 + $0xe0] sm:$0xff]  ;;  %s1166_s28 = sshll.u32 %s1162_s25, 4  ;;  %s1167_s28 = int_to_ptr.hbm [resolvable:$true] %s1166_s28 }
 0x453   : > { %s1561_s29 = sshra.s32 %s1167_s28, 4  ;;  %s1562_s29 = int_to_ptr.hbm [resolvable:$true] %s1561_s29 }
 0x454   : > { %s1563_s14 = scalar_lea.hbm %s1562_s29, 8  ;;  %p1568_p0 = scmp.lt.s32.totalorder %s1562_s29, %s2005_s9 }
 0x455   : > { %1126 = vmatpush.bf16.msra.mxu2 %v1458_v1  ;;  %p1564_p11 = scmp.ne.s32.totalorder %s1562_s29, %s1563_s14  ;;  %p1569_p1 = scmp.lt.s32.totalorder %s1567_s22, %s1563_s14 }
 0x457   : > { %p1565_p12 = pnand %p1564_p11, %p1714_p5  ;;  %p1570_p2 = por %p1569_p1, %p1568_p0 }
 0x459   : > { %p1566_p13 = pneg %p1565_p12 }
 0x45b   : > { %p1571_p3 = pnand %p1570_p2, %p1566_p13 }
 0x4aa   : > { %v644_v5 = vpop.permute.xlu2 %643 }
 0x4b2   : > { %v639_v2 = vpop.permute.xlu1 %638 }
 0x4b3   : > { %v652_v4 = vsel %vm409_vm5, %v463_v3, %v639_v2 }
 0x4b4   : > { %v655_v7 = vsel %vm653_vm7, %v652_v4, %v644_v5  ;;  %v1441_v4 = vld [vmem:[%s2004_s8 + $0x18] sm:$0xff] }
 0x4b5   : > { %v1465_v5 = vld [vmem:[%s2004_s8 + $0xd8] sm:$0xff]  ;;  %1101 = vmatpush.bf16.msrb.mxu1 %v1441_v4 }
 0x4c2   : > { %v649_v6 = vpop.permute.xlu0 %648 }
 0x4c3   : > { %v658_v9 = vsel %vm656_vm8, %v655_v7, %v649_v6  ;;  %v1449_v6 = vld [vmem:[%s2004_s8 + $0x58] sm:$0xff] }
 0x4c4   : > { %1257 = vmatmul.msk.bf16.vlgmr.msra.gmra.mxu0 %vm332_vm0, %v658_v9  ;;  %v1457_v7 = vld [vmem:[%s2004_s8 + $0x98] sm:$0xff] }
 0x4c5   : > { %1136 = vmatpush.bf16.msra.mxu0 %v1469_v48  ;;  %1127 = vmatpush.bf16.msra.mxu2 %v1457_v7 }
 0x4c9   : > { %1137 = vmatpush.bf16.msra.mxu0 %v1468_v53 }
 0x4cd   : > { %1138 = vmatpush.bf16.msra.mxu0 %v1467_v57 }
 0x4d1   : > { %1139 = vmatpush.bf16.msra.mxu0 %v1466_v61 }
 0x4d5   : > { %1140 = vmatpush.bf16.msra.mxu0 %v1465_v5 }
 0x541   : > { %v687_v12 = vpop.f32.mrf.mxu0 }
 0x542   : > { %v688_v13 = vadd.f32 %v687_v12, %v663_v11  ;;  %v1440_v12 = vld [vmem:[%s2004_s8 + $0x10] sm:$0xff] }
 0x543   : > { %1102 = vmatpush.bf16.msrb.mxu1 %v1440_v12 }
 0x544   : > { %v1795_v14 = vadd.f32 %v688_v13, %v1729_v0  ;;  %v1434_v0 = vld [vmem:[%s2002_s6 + $0x24] sm:$0xf]  ;;  %v1464_v13 = vld [vmem:[%s2004_s8 + $0xd0] sm:$0xff] }
 0x545   : > { %v1281_v25 = vor.u32 %v1434_v0, %v1278_v22  ;;  %1141 = vmatpush.bf16.msra.mxu0 %v1464_v13 }
 0x546   : > { %v692_v15 = vsel %vm332_vm0, %v1795_v14, 0.0 }
 0x547   : > { %693 = vadd.xlane.f32.xlu2 %v692_v15  ;;  %799 = vmatpush.bf16.msra.mxu3 %v1281_v25  ;;  %v1456_v25 = vld [vmem:[%s2004_s8 + $0x90] sm:$0xff] }
 0x548   : > { %1103 = vmatpush.bf16.msrb.mxu1 %v1439_v23  ;;  %1128 = vmatpush.bf16.msra.mxu2 %v1456_v25 }
 0x549   : > { %v689_v16 = vpop.f32.mrf.mxu0 }
 0x54a   : > { %v714_v16 = vperm.slane %v1748_v24, 2 }
 0x54b   : > { %800 = vmatpush.bf16.msra.mxu3 %v1265_v37 }
 0x54c   : > { %1104 = vmatpush.bf16.msrb.mxu1 %v1438_v26  ;;  %1129 = vmatpush.bf16.msra.mxu2 %v1455_v29 }
 0x54f   : > { %1110 = vmatpush.bf16.msrb.mxu3 %v1453_v50 }
 0x550   : > { %1130 = vmatpush.bf16.msra.mxu2 %v1454_v31 }
 0x5ba   : > { %v694_v17 = vpop.xlane.xlu2 %693 }
 0x5bb   : > { %v695_v18 = vmul.f32 %v694_v17, %v1733_v8 }
 0x5bd   : > { %v1801_v19 = vsub.f32 %v1795_v14, %v695_v18 }
 0x5bf   : > { %v697_v20 = vmul.f32 %v1801_v19, %v1801_v19 }
 0x5c1   : > { %v698_v21 = vsel %vm332_vm0, %v697_v20, 0.0  ;;  %v716_v20 = vperm.slane %v1748_v24, 3  ;;  %v1448_v24 = vld [vmem:[%s2004_s8 + $0x50] sm:$0xff] }
 0x5c2   : > { %699 = vadd.xlane.f32.xlu0 %v698_v21 }
 0x635   : > { %v700_v46 = vpop.xlane.xlu0 %699 }
 0x636   : > { %v701_v49 = vmul.f32 %v700_v46, %v1733_v8  ;;  %v1452_v8 = vld [vmem:[%s2004_s8 + $0x70] sm:$0xff] }
 0x637   : > { %1111 = vmatpush.bf16.msrb.mxu3 %v1452_v8 }
 0x638   : > { %v702_v54 = vadd.f32 1e-06, %v701_v49 }
 0x63a   : > { %1545 = vrsqrt.f32 %v702_v54  ;;  %vm709_vm10 = vweird.f32 %v702_v54 }
 0x63b   : > { %1112 = vmatpush.bf16.msrb.mxu3 %v1451_v58  ;;  %v904_v58 = vperm.slane %v1791_v10, 1 }
 0x63f   : > { %1113 = vmatpush.bf16.msrb.mxu3 %v1450_v63 }
 0x640   : > { %v1546_v62 = vpop.eup %1545 }
 0x641   : > { %v704_v2 = vmul.f32 %v1546_v62, %v702_v54  ;;  %vm710_vm9 = vweird.f32 %v1546_v62 }
 0x642   : > { %vm711_vm11 = vmor %vm709_vm10, %vm710_vm9 }
 0x643   : > { %v705_v3 = vmul.f32 %v1546_v62, %v704_v2  ;;  %1114 = vmatpush.bf16.msrb.mxu3 %v1449_v6 }
 0x645   : > { %v706_v9 = vmul.f32 0.5, %v705_v3 }
 0x647   : > { %v707_v11 = vsub.f32 1.5, %v706_v9  ;;  %1115 = vmatpush.bf16.msrb.mxu3 %v1448_v24 }
 0x649   : > { %v708_v15 = vmul.f32 %v1546_v62, %v707_v11 }
 0x64b   : > { %v712_v17 = vsel %vm711_vm11, %v1546_v62, %v708_v15  ;;  %1116 = vmatpush.bf16.msrb.mxu3 %v1447_v28 }
 0x64c   : > { %v713_v18 = vmul.f32 %v712_v17, %v1801_v19  ;;  %v1463_v19 = vld [vmem:[%s2004_s8 + $0xc8] sm:$0xff] }
 0x64d   : > { %1142 = vmatpush.bf16.msra.mxu0 %v1463_v19 }
 0x64e   : > { %v715_v21 = vmul.f32 %v714_v16, %v713_v18 }
 0x64f   : > { %1117 = vmatpush.bf16.msrb.mxu3 %v1446_v30 }
 0x650   : > { %v717_v0 = vadd.f32 %v716_v20, %v715_v21 }
 0x651   : > { %1143 = vmatpush.bf16.msra.mxu0 %v1462_v27 }
 0x652   : > { %v718_v22 = vpack.c.bf16 %v717_v0, %v717_v0 }
 0x654   : > { %1290 = vmatmul.msk.bf16.vlgmr.msra.gmra.mxu1 %vm332_vm0, %v718_v22  ;;  %1291 = vmatmul.msk.bf16.vlgmr.msra.gmra.mxu3 %vm332_vm0, %v718_v22 }
 0x655   : > { %1292 = vmatmul.msk.bf16.vlgmr.msrb.gmra.mxu2 %vm332_vm0, %v718_v22  ;;  %1293 = vmatmul.msk.bf16.vlgmr.msrb.gmra.mxu0 %vm332_vm0, %v718_v22 }
 0x6d1   : > { %v789_v35 = vpop.f32.mrf.mxu1 }
 0x6d2   : > { %v790_v36 = vadd.f32 %v789_v35, %v729_v33  ;;  %v828_v37 = vpop.f32.mrf.mxu0 }
 0x6d3   : > { %v829_v38 = vadd.f32 %v828_v37, %v732_v34 }
 0x6d4   : > { %v832_v39 = vmax.f32 %v790_v36, 0.0 }
 0x6d5   : > { %v835_v41 = vmax.f32 %v829_v38, 0.0 }
 0x6d6   : > { %v836_v43 = vpack.c.bf16 %v832_v39, %v832_v39 }
 0x6d7   : > { %v839_v44 = vpack.c.bf16 %v835_v41, %v835_v41  ;;  %v802_v45 = vpop.f32.mrf.mxu3 }
 0x6d8   : > { %v803_v46 = vadd.f32 %v802_v45, %v730_v40  ;;  %v815_v47 = vpop.f32.mrf.mxu2  ;;  %1105 = vmatmul.bf16.vlgmr.msrb.gmra.mxu1 %v836_v43 }
 0x6d9   : > { %v816_v48 = vadd.f32 %v815_v47, %v731_v42  ;;  %1144 = vmatmul.bf16.vlgmr.msra.gmra.mxu0 %v839_v44  ;;  %v791_v49 = vpop.f32.mrf.mxu1 }
 0x6da   : > { %v833_v50 = vmax.f32 %v803_v46, 0.0  ;;  %v830_v51 = vpop.f32.mrf.mxu0 }
 0x6db   : > { %v834_v52 = vmax.f32 %v816_v48, 0.0 }
 0x6dc   : > { %v837_v53 = vpack.c.bf16 %v833_v50, %v833_v50 }
 0x6dd   : > { %v838_v54 = vpack.c.bf16 %v834_v52, %v834_v52 }
 0x6de   : > { %1118 = vmatmul.bf16.vlgmr.msrb.gmra.mxu3 %v837_v53 }
 0x6df   : > { %1131 = vmatmul.bf16.vlgmr.msra.gmra.mxu2 %v838_v54  ;;  %v804_v8 = vpop.f32.mrf.mxu3 }
 0x6e0   : > { %v817_v55 = vpop.f32.mrf.mxu2 }
 0x755   : > { %v1106_v56 = vpop.f32.mrf.mxu1 }
 0x756   : > { %v1145_v57 = vpop.f32.mrf.mxu0  ;;  %v1107_v61 = vadd.f32 %v1106_v56, %v904_v58 }
 0x75d   : > { %v1108_v59 = vpop.f32.mrf.mxu1 }
 0x75e   : > { %v1147_v60 = vpop.f32.mrf.mxu0 }
 0x761   : > { %v1119_v62 = vpop.f32.mrf.mxu3 }
 0x762   : > { %v1120_v63 = vadd.f32 %v1119_v62, %v1107_v61  ;;  %v1132_v1 = vpop.f32.mrf.mxu2 }
 0x764   : > { %v1133_v2 = vadd.f32 %v1132_v1, %v1120_v63 }
 0x766   : > { %v1146_v3 = vadd.f32 %v1145_v57, %v1133_v2 }
 0x768   : > { %v1149_v10 = vadd.f32 %v1146_v3, %v1795_v14 }
 0x769   : > { %v1121_v4 = vpop.f32.mrf.mxu3 }
 0x76a   : > { %v1134_v5 = vpop.f32.mrf.mxu2  ;;  %1150 = vst.msk [vmem:[%s323_s26] sm:$0xff] %vm332_vm0, %v1149_v10 }
 0x76b   : > { %1574 = shalt.err (!%p1571_p3)
}
 0x76c   : > { %1470 = dma.vmem_to_hbm [thread:$0]  (%p1714_p5), %s1165_s27, 128, %s1167_s28, %s1152_s13  }
 0x76d PF: > { %p1476_p4 = scmp.ge.s32.totalorder %s1609_s12, 2  ;;  %s1178_s17 = sand.u32 1, %s1597_s30  }
 0x76e   : > { %s1179_s25 = scalar_lea.sflag [#allocation3], %s1178_s17 }
 0x76f   : > { %p1473_p7 = pnand %p1476_p4, %p1718_p6 }
 0x771   : > { %p1474_p8 = pneg %p1473_p7 }
 0x773   : > { %1592 = dma.done.wait (%p1474_p8), %s1179_s25, 128  }
 0x774   : > { %1594 = vsyncadd (%p1474_p8), %s1179_s25, 4294967168  ;;  %p19_p9 = scmp.ge.s32.totalorder %s1701_s15, 4   ;;  %s2008_s30 = smov %s1601_s10 }
 0x775   : > { %s2009_s10 = smov %s1605_s11  ;;  %s2010_s11 = smov %s1712_s18 }
 0x776   : > { %s2011_s12 = smov %s1701_s15  ;;  %21 = sbr.rel (!%p19_p9) target bundleno = 3 (0x3), region = 91 }
 0x77b   :  { %1185 = vsyncpa [#allocation3], 1 }
 0x77c   :  { %1187 = vsyncpa [#allocation3 + $0x1], 1 }

// kernel: tpu_custom_call.1
= control target key start
LH: loop header
LB: loop body
LE: loop exit
PB: predicated region body
PF: predicated region fallthrough
CT: control target
= control target key end

     0   :  { %14 = vsyncpa [#allocation3], 0  ;;  %s1996_s0 = inlined_call_operand.vmem [shape: f32[2,8,32], index: 0, kind: input, shape index: {}]   ;;  %s1997_s1 = inlined_call_operand.vmem [shape: f32[4,32], index: 1, kind: input, shape index: {}]   ;;  %s1998_s2 = inlined_call_operand.vmem [shape: bf16[32,96], index: 2, kind: input, shape index: {}]   ;;  %s1999_s3 = inlined_call_operand.vmem [shape: f32[1,96], index: 3, kind: input, shape index: {}]   ;;  %s2000_s4 = inlined_call_operand.vmem [shape: bf16[32,32], index: 4, kind: input, shape index: {}]   ;;  %s2001_s5 = inlined_call_operand.vmem [shape: f32[2,32], index: 5, kind: input, shape index: {}]   ;;  %s2002_s6 = inlined_call_operand.vmem [shape: bf16[32,512], index: 6, kind: input, shape index: {}]   ;;  %s2003_s7 = inlined_call_operand.vmem [shape: f32[1,512], index: 7, kind: input, shape index: {}]   ;;  %s2004_s8 = inlined_call_operand.vmem [shape: bf16[512,32], index: 8, kind: input, shape index: {}]   ;;  %s2005_s9 = inlined_call_operand.hbm [shape: f32[2,8,32], index: 9, kind: output, shape index: {}]  }
   0x1   :  { %16 = vsyncpa [#allocation3 + $0x1], 0  ;;  %s1676_s30 = smov 0   ;;  %s1678_s10 = smov 0  }
   0x2   :  { %s1680_s11 = smov 0   ;;  %s1682_s12 = smov 0  }
   0x3 LB: > { %s1697_s13 = sadd.s32 4294967295, %s1609_s12   ;;  %s1226_s14 = sadd.s32 4294967294, %s1609_s12   ;;  %s1609_s12 = sphi %s1682_s12, %s2011_s12   ;;  %s1605_s11 = sphi %s1680_s11, %s2010_s11   ;;  %s1601_s10 = sphi %s1678_s10, %s2009_s10   ;;  %s1597_s30 = sphi %s1676_s30, %s2008_s30  }
   0x4   : > { %s1701_s15 = sadd.s32 1, %s1609_s12   ;;  %s223_s16 = sadd.s32 1, %s1605_s11 }
   0x5   : > { %s220_s17 = ssub.s32 %s1609_s12, %s1701_s15  ;;  %p233_p0 = scmp.ne.s32.totalorder %s1605_s11, %s1601_s10 }
   0x6   : > { %p221_p1 = scmp.eq.s32.totalorder %s220_s17, 0  ;;  %p234_p2 = scmp.eq.s32.totalorder %s1697_s13, 1 }
   0x7   : > { %p239_p3 = scmp.ne.s32.totalorder %s1601_s10, %s1597_s30  ;;  %p240_p4 = scmp.eq.s32.totalorder %s1226_s14, 1 }
   0x8   : > { %s1712_s18 = scalar_select %p221_p1, %s1605_s11, %s223_s16  }
   0x9   : > { %p1714_p5 = por %p234_p2, %p233_p0  ;;  %p1718_p6 = por %p240_p4, %p239_p3 }
   0xa   : > { %p1229_p7 = scmp.ge.s32.totalorder %s1609_s12, 1  ;;  %p289_p8 = scmp.lt.s32.totalorder %s1609_s12, 3 }
   0xc   : > { %p290_p9 = pnand %p1229_p7, %p289_p8 }
   0xd   : > { %p324_p10 = scmp.lt.s32.totalorder (!%p290_p9), %s1697_s13, 1  ;;  %s1613_s23 = smov (!%p290_p9), 120  }
   0xe   : > { %293 = sbr.rel (%p290_p9) target bundleno = 1901 (0x76d), region = 56  ;;  %s1614_s24 = smov (!%p290_p9), 96  }
   0xf   : > { %s1616_s26 = smov (!%p290_p9), 88   ;;  %s1617_s27 = smov (!%p290_p9), 112  }
  0x10   : > { %s1618_s28 = smov (!%p290_p9), 80   ;;  %s1619_s29 = smov (!%p290_p9), 64  }
  0x11   : > { %s1620_s14 = smov (!%p290_p9), 56   ;;  %s1621_s16 = smov (!%p290_p9), 40  }
  0x12   : > { %s1622_s17 = smov (!%p290_p9), 48  }
  0x13   : > { %s325_s21 = scalar_select %p324_p10, %s1697_s13, 1  ;;  %vm332_vm0 = vcmask 261120   ;;  %v1611_v2 = vmov 32.0   ;;  %v1427_v14 = vld [vmem:[%s1998_s2 + $0x8] sm:$0xff]  ;;  %v1426_v15 = vld [vmem:[%s1998_s2] sm:$0xff]  ;;  %vm409_vm5 = vcmask 64512  }
  0x14   : > { %1525 = vrcp.f32 %v1611_v2  ;;  %396 = vmatpush.bf16.msra.mxu0 %v1427_v14  ;;  %v1748_v24 = vld [vmem:[%s1997_s1] sm:$0xf]  ;;  %vm446_vm6 = vcmask 1043456   ;;  %vm653_vm7 = vcmask 130048   ;;  %vm656_vm8 = vcmask 195584  }
  0x15   : > { %s1231_s22 = sshll.u32 %s325_s21, 3  ;;  %v362_v26 = vperm.slane %v1748_v24, 0  ;;  %v364_v29 = vperm.slane %v1748_v24, 1  ;;  %v1524_v33 = vld [vmem:[%s1999_s3] ss:$0 sm:$0xff]  ;;  %s1623_s21 = smov 8  }
  0x16   : > { %s327_s25 = scalar_lea.vmem %s1996_s0, %s1231_s22  ;;  %s1612_s22 = smov 104  }
  0x17   : > { %v1729_v0 = vld [vmem:[%s327_s25] sm:$0xff]  ;;  %s1615_s25 = smov 72  }
  0x18   : > { %v333_v1 = vsel %vm332_vm0, %v1729_v0, 0.0  ;;  %397 = vmatpush.bf16.msra.mxu0 %v1426_v15 }
  0x19   : > { %334 = vadd.xlane.f32.xlu0 %v333_v1 }
  0x1a   : > { %v1526_v3 = vpop.eup %1525 }
  0x1b   : > { %v337_v4 = vmul.f32 32.0, %v1526_v3  ;;  %vm341_vm1 = vweird.f32 %v1526_v3 }
  0x1d   : > { %v338_v5 = vsub.f32 1.0, %v337_v4 }
  0x1f   : > { %v339_v6 = vmul.f32 %v1526_v3, %v338_v5 }
  0x21   : > { %v340_v7 = vadd.f32 %v1526_v3, %v339_v6 }
  0x23   : > { %v1733_v8 = vsel %vm341_vm1, %v1526_v3, %v340_v7 }
  0x8c   : > { %v335_v9 = vpop.xlane.xlu0 %334 }
  0x8d   : > { %v343_v10 = vmul.f32 %v1733_v8, %v335_v9 }
  0x8f   : > { %v344_v11 = vsub.f32 %v1729_v0, %v343_v10 }
  0x91   : > { %v345_v12 = vmul.f32 %v344_v11, %v344_v11 }
  0x93   : > { %v346_v13 = vsel %vm332_vm0, %v345_v12, 0.0 }
  0x94   : > { %347 = vadd.xlane.f32.xlu0 %v346_v13 }
 0x107   : > { %v348_v16 = vpop.xlane.xlu0 %347 }
 0x108   : > { %v349_v17 = vmul.f32 %v348_v16, %v1733_v8 }
 0x10a   : > { %v350_v18 = vadd.f32 1e-06, %v349_v17 }
 0x10c   : > { %1527 = vrsqrt.f32 %v350_v18  ;;  %vm357_vm3 = vweird.f32 %v350_v18 }
 0x112   : > { %v1528_v19 = vpop.eup %1527 }
 0x113   : > { %v352_v20 = vmul.f32 %v1528_v19, %v350_v18  ;;  %vm358_vm2 = vweird.f32 %v1528_v19 }
 0x114   : > { %vm359_vm4 = vmor %vm357_vm3, %vm358_vm2 }
 0x115   : > { %v353_v21 = vmul.f32 %v1528_v19, %v352_v20 }
 0x117   : > { %v354_v22 = vmul.f32 0.5, %v353_v21 }
 0x119   : > { %v355_v23 = vsub.f32 1.5, %v354_v22 }
 0x11b   : > { %v356_v25 = vmul.f32 %v1528_v19, %v355_v23 }
 0x11d   : > { %v360_v27 = vsel %vm359_vm4, %v1528_v19, %v356_v25 }
 0x11e   : > { %v361_v28 = vmul.f32 %v360_v27, %v344_v11 }
 0x120   : > { %v363_v30 = vmul.f32 %v362_v26, %v361_v28 }
 0x122   : > { %v365_v31 = vadd.f32 %v364_v29, %v363_v30 }
 0x124   : > { %v366_v32 = vpack.c.bf16 %v365_v31, %v365_v31 }
 0x126   : > { %1240 = vmatmul.msk.bf16.vlgmr.msra.gmra.mxu0 %vm332_vm0, %v366_v32 }
 0x1a3   : > { %v399_v34 = vpop.f32.mrf.mxu0 }
 0x1a4   : > { %v400_v35 = vadd.f32 %v1524_v33, %v399_v34 }
 0x1a6   : > { %v403_v36 = vpack.c.bf16 %v400_v35, %v400_v35 }
 0x1a8   : > { %v405_v37 = vunpack.c.l.b16 %v403_v36 }
 0x1aa   : > { %v406_v38 = vpack.c.b16 %v405_v37, %v405_v37 }
 0x1ab   : > { %v401_v39 = vpop.f32.mrf.mxu0 }
 0x1ac   : > { %578 = vrot.lane.b32.xlu0 %v406_v38, %s1612_s22  ;;  %464 = vrot.lane.b32.xlu2 %v406_v38, %s1613_s23  ;;  %s1624_s22 = smov 24   ;;  %s1625_s23 = smov 16  }
 0x1ad   : > { %407 = vrot.lane.b32.xlu1 %v406_v38, %s1614_s24 }
 0x1b4   : > { %580 = vrot.lane.b32.xlu2 %v406_v38, %s1615_s25 }
 0x1b5   : > { %466 = vrot.lane.b32.xlu1 %v406_v38, %s1616_s26 }
 0x1bc   : > { %521 = vrot.lane.b32.xlu2 %v406_v38, %s1617_s27 }
 0x1bd   : > { %523 = vrot.lane.b32.xlu1 %v406_v38, %s1618_s28 }
 0x206   : > { %v465_v40 = vpop.permute.xlu2 %464 }
 0x20e   : > { %v581_v43 = vpop.permute.xlu2 %580 }
 0x20f   : > { %v586_v46 = vsel %vm409_vm5, %v581_v43, 0 }
 0x216   : > { %v522_v49 = vpop.permute.xlu2 %521 }
 0x21e   : > { %v579_v50 = vpop.permute.xlu0 %578 }
 0x21f   : > { %v408_v41 = vpop.permute.xlu1 %407 }
 0x220   : > { %v414_v42 = vsel %vm409_vm5, %v408_v41, 0 }
 0x221   : > { %423 = vmatpush.bf16.xpose.msra.mxu1 %v414_v42 }
 0x227   : > { %v467_v44 = vpop.permute.xlu1 %466 }
 0x228   : > { %1241 = vmatmul.msk.bf16.vlgmr.msra.gmra.mxu1 %vm409_vm5, %v403_v36  ;;  %v472_v45 = vsel %vm409_vm5, %v467_v44, 0 }
 0x229   : > { %481 = vmatpush.bf16.xpose.msra.mxu3 %v472_v45 }
 0x22f   : > { %v524_v47 = vpop.permute.xlu1 %523 }
 0x230   : > { %1243 = vmatmul.msk.bf16.vlgmr.msra.gmra.mxu3 %vm409_vm5, %v465_v40  ;;  %v529_v48 = vsel %vm409_vm5, %v524_v47, 0 }
 0x231   : > { %595 = vmatpush.bf16.xpose.msrb.mxu3 %v586_v46  ;;  %538 = vmatpush.bf16.xpose.msrb.mxu0 %v529_v48 }
 0x238   : > { %1245 = vmatmul.msk.bf16.vlgmr.msrb.gmra.mxu0 %vm409_vm5, %v522_v49 }
 0x240   : > { %1247 = vmatmul.msk.bf16.vlgmr.msrb.gmra.mxu3 %vm409_vm5, %v579_v50 }
 0x2a5   : > { %v425_v51 = vpop.f32.mrf.mxu1 }
 0x2a6   : > { %v429_v52 = vsel %vm409_vm5, %v425_v51, -inf }
 0x2a7   : > { %430 = vmax.xlane.f32.xlu1 %v429_v52 }
 0x2ad   : > { %v427_v53 = vpop.f32.mrf.mxu1 }
 0x2b3   : > { %v483_v54 = vpop.f32.mrf.mxu3 }
 0x2b4   : > { %v487_v55 = vsel %vm409_vm5, %v483_v54, -inf }
 0x2b5   : > { %488 = vmax.xlane.f32.xlu2 %v487_v55  ;;  %v540_v56 = vpop.f32.mrf.mxu0 }
 0x2b6   : > { %v544_v58 = vsel %vm409_vm5, %v540_v56, -inf }
 0x2bb   : > { %v485_v57 = vpop.f32.mrf.mxu3 }
 0x2bd   : > { %545 = vmax.xlane.f32.xlu2 %v544_v58  ;;  %v542_v59 = vpop.f32.mrf.mxu0 }
 0x2c3   : > { %v597_v60 = vpop.f32.mrf.mxu3 }
 0x2c4   : > { %v601_v61 = vsel %vm409_vm5, %v597_v60, -inf }
 0x2c5   : > { %602 = vmax.xlane.f32.xlu0 %v601_v61 }
 0x2cb   : > { %v599_v62 = vpop.f32.mrf.mxu3 }
 0x2d5   : > { %441 = vrot.lane.b32.xlu2 %v406_v38, %s1619_s29 }
 0x2d9   : > { %499 = vrot.lane.b32.xlu0 %v406_v38, %s1620_s14 }
 0x2dd   : > { %613 = vrot.lane.b32.xlu2 %v406_v38, %s1621_s16 }
 0x2e1   : > { %556 = vrot.lane.b32.xlu0 %v406_v38, %s1622_s17  ;;  %s321_s17 = sand.u32 1, %s1601_s10  }
 0x31a   : > { %v431_v63 = vpop.xlane.xlu1 %430 }
 0x31b   : > { %v432_v1 = vsub.f32 %v425_v51, %v431_v63  ;;  %v1429_v63 = vld [vmem:[%s2000_s4 + $0x8] sm:$0xff] }
 0x31c   : > { %684 = vmatpush.bf16.msra.mxu0 %v1429_v63  ;;  %v1450_v63 = vld [vmem:[%s2004_s8 + $0x60] sm:$0xff] }
 0x31d   : > { %v433_v2 = vmul.f32 1.442695, %v432_v1  ;;  %v1428_v1 = vld [vmem:[%s2000_s4] sm:$0xff] }
 0x31f   : > { %1529 = vpow2.f32 %v433_v2 }
 0x320   : > { %685 = vmatpush.bf16.msra.mxu0 %v1428_v1  ;;  %v1458_v1 = vld [vmem:[%s2004_s8 + $0xa0] sm:$0xff] }
 0x325   : > { %v1530_v3 = vpop.eup %1529 }
 0x326   : > { %v435_v4 = vsel %vm409_vm5, %v1530_v3, 0.0 }
 0x327   : > { %436 = vadd.xlane.f32.xlu1 %v435_v4 }
 0x328   : > { %v489_v5 = vpop.xlane.xlu2 %488 }
 0x329   : > { %v490_v6 = vsub.f32 %v483_v54, %v489_v5 }
 0x32b   : > { %v491_v7 = vmul.f32 1.442695, %v490_v6 }
 0x32d   : > { %1531 = vpow2.f32 %v491_v7 }
 0x330   : > { %v546_v9 = vpop.xlane.xlu2 %545 }
 0x331   : > { %v547_v16 = vsub.f32 %v540_v56, %v546_v9 }
 0x333   : > { %v1532_v10 = vpop.eup %1531  ;;  %v548_v18 = vmul.f32 1.442695, %v547_v16 }
 0x334   : > { %v493_v11 = vsel %vm409_vm5, %v1532_v10, 0.0 }
 0x335   : > { %494 = vadd.xlane.f32.xlu1 %v493_v11 }
 0x338   : > { %v603_v12 = vpop.xlane.xlu0 %602  ;;  %v442_v13 = vpop.permute.xlu2 %441 }
 0x339   : > { %v604_v14 = vsub.f32 %v597_v60, %v603_v12  ;;  %v448_v15 = vsel %vm446_vm6, %v442_v13, 0 }
 0x33a   : > { %457 = vmatpush.bf16.msra.mxu2 %v448_v15 }
 0x33b   : > { %v605_v17 = vmul.f32 1.442695, %v604_v14 }
 0x33d   : > { %1533 = vpow2.f32 %v605_v17 }
 0x33e   : > { %1535 = vpow2.f32 %v548_v18 }
 0x340   : > { %v614_v31 = vpop.permute.xlu2 %613 }
 0x341   : > { %v619_v33 = vsel %vm446_vm6, %v614_v31, 0  ;;  %v1435_v31 = vld [vmem:[%s2002_s6 + $0x2c] sm:$0xf] }
 0x343   : > { %v1534_v19 = vpop.eup %1533 }
 0x344   : > { %v607_v20 = vsel %vm409_vm5, %v1534_v19, 0.0  ;;  %v1536_v21 = vpop.eup %1535 }
 0x345   : > { %608 = vadd.xlane.f32.xlu1 %v607_v20  ;;  %v550_v25 = vsel %vm409_vm5, %v1536_v21, 0.0 }
 0x34b   : > { %v500_v22 = vpop.permute.xlu0 %499 }
 0x34c   : > { %v505_v23 = vsel %vm446_vm6, %v500_v22, 0  ;;  %v1278_v22 = vld [vmem:[%s2002_s6 + $0x30] sm:$0xf0] }
 0x34d   : > { %514 = vmatpush.bf16.msrb.mxu2 %v505_v23  ;;  %551 = vadd.xlane.f32.xlu1 %v550_v25  ;;  %v1284_v23 = vld [vmem:[%s2002_s6 + $0x28] sm:$0xf] }
 0x353   : > { %v557_v26 = vpop.permute.xlu0 %556 }
 0x354   : > { %v562_v27 = vsel %vm446_vm6, %v557_v26, 0  ;;  %v1437_v26 = vld [vmem:[%s2002_s6 + $0x34] sm:$0xf0] }
 0x355   : > { %571 = vmatpush.bf16.msrb.mxu1 %v562_v27  ;;  %v1276_v27 = vld [vmem:[%s2002_s6 + $0x20] sm:$0xf] }
 0x39a   : > { %v437_v28 = vpop.xlane.xlu1 %436 }
 0x39b   : > { %1537 = vrcp.f32 %v437_v28  ;;  %v1436_v28 = vld [vmem:[%s2002_s6 + $0x2c] sm:$0xf0] }
 0x3a1   : > { %v1538_v29 = vpop.eup %1537 }
 0x3a2   : > { %v439_v30 = vmul.f32 %v1538_v29, %v1530_v3  ;;  %v1285_v29 = vor.u32 %v1437_v26, %v1284_v23  ;;  %v1439_v23 = vld [vmem:[%s2004_s8 + $0x8] sm:$0xff]  ;;  %v1438_v26 = vld [vmem:[%s2004_s8] sm:$0xff] }
 0x3a4   : > { %v440_v32 = vpack.c.bf16 %v439_v30, %v439_v30  ;;  %v1277_v30 = vor.u32 %v1436_v28, %v1276_v27  ;;  %v1462_v27 = vld [vmem:[%s2004_s8 + $0xc0] sm:$0xff]  ;;  %v1447_v28 = vld [vmem:[%s2004_s8 + $0x48] sm:$0xff] }
 0x3a6   : > { %1242 = vmatmul.msk.bf16.vlgmr.msra.gmra.mxu2 %vm409_vm5, %v440_v32  ;;  %v1286_v32 = vld [vmem:[%s2002_s6 + $0x38] sm:$0xf0]  ;;  %786 = vmatpush.bf16.msra.mxu1 %v1277_v30  ;;  %v1446_v30 = vld [vmem:[%s2004_s8 + $0x40] sm:$0xff] }
 0x3a7   : > { %628 = vmatpush.bf16.msra.mxu2 %v619_v33  ;;  %v1430_v33 = vld [vmem:[%s2002_s6 + $0x4] sm:$0xf] }
 0x3a8   : > { %v495_v34 = vpop.xlane.xlu1 %494 }
 0x3a9   : > { %1539 = vrcp.f32 %v495_v34  ;;  %v1262_v34 = vld [vmem:[%s2002_s6 + $0x10] sm:$0xf0] }
 0x3af   : > { %v1540_v35 = vpop.eup %1539 }
 0x3b0   : > { %v497_v36 = vmul.f32 %v1540_v35, %v1532_v10  ;;  %v1791_v10 = vld [vmem:[%s2001_s5] sm:$0x3]  ;;  %v1289_v35 = vor.u32 %v1435_v31, %v1286_v32 }
 0x3b1   : > { %v663_v11 = vperm.slane %v1791_v10, 0  ;;  %v1454_v31 = vld [vmem:[%s2004_s8 + $0x80] sm:$0xff] }
 0x3b2   : > { %v498_v37 = vpack.c.bf16 %v497_v36, %v497_v36  ;;  %v1268_v36 = vld [vmem:[%s2002_s6 + $0x8] sm:$0xf]  ;;  %825 = vmatpush.bf16.msrb.mxu0 %v1289_v35  ;;  %v727_v32 = vld [vmem:[%s2003_s7] sm:$0xf] }
 0x3b6   : > { %1244 = vmatmul.msk.bf16.vlgmr.msrb.gmra.mxu2 %vm409_vm5, %v498_v37  ;;  %v1265_v37 = vor.u32 %v1430_v33, %v1262_v34  ;;  %v729_v33 = vperm.slane %v727_v32, 0  ;;  %v732_v34 = vperm.slane %v727_v32, 3 }
 0x3b7   : > { %812 = vmatpush.bf16.msrb.mxu2 %v1285_v29  ;;  %v1455_v29 = vld [vmem:[%s2004_s8 + $0x88] sm:$0xff] }
 0x3b8   : > { %v609_v38 = vpop.xlane.xlu1 %608 }
 0x3b9   : > { %1541 = vrcp.f32 %v609_v38  ;;  %v1433_v38 = vld [vmem:[%s2002_s6 + $0x14] sm:$0xf0] }
 0x3bf   : > { %v1542_v39 = vpop.eup %1541 }
 0x3c0   : > { %v611_v40 = vmul.f32 %v1542_v39, %v1534_v19  ;;  %v552_v41 = vpop.xlane.xlu1 %551  ;;  %v1260_v39 = vld [vmem:[%s2002_s6] sm:$0xf] }
 0x3c1   : > { %1543 = vrcp.f32 %v552_v41  ;;  %v1269_v41 = vor.u32 %v1433_v38, %v1268_v36 }
 0x3c2   : > { %v612_v42 = vpack.c.bf16 %v611_v40, %v611_v40  ;;  %v1432_v40 = vld [vmem:[%s2002_s6 + $0xc] sm:$0xf0] }
 0x3c3   : > { %813 = vmatpush.bf16.msrb.mxu2 %v1269_v41 }
 0x3c6   : > { %1248 = vmatmul.msk.bf16.vlgmr.msra.gmra.mxu2 %vm409_vm5, %v612_v42  ;;  %v1261_v42 = vor.u32 %v1432_v40, %v1260_v39  ;;  %v730_v40 = vperm.slane %v727_v32, 1 }
 0x3c7   : > { %v1544_v43 = vpop.eup %1543 }
 0x3c8   : > { %v554_v44 = vmul.f32 %v1544_v43, %v1536_v21  ;;  %v1431_v43 = vld [vmem:[%s2002_s6 + $0xc] sm:$0xf]  ;;  %787 = vmatpush.bf16.msra.mxu1 %v1261_v42  ;;  %v731_v42 = vperm.slane %v727_v32, 2 }
 0x3ca   : > { %v555_v45 = vpack.c.bf16 %v554_v44, %v554_v44  ;;  %v1270_v44 = vld [vmem:[%s2002_s6 + $0x18] sm:$0xf0] }
 0x3cc   : > { %1246 = vmatmul.msk.bf16.vlgmr.msrb.gmra.mxu1 %vm409_vm5, %v555_v45  ;;  %v1273_v45 = vor.u32 %v1431_v43, %v1270_v44 }
 0x3ce   : > { %826 = vmatpush.bf16.msrb.mxu0 %v1273_v45 }
 0x429   : > { %v459_v46 = vpop.f32.mrf.mxu2 }
 0x42a   : > { %v463_v3 = vpack.c.bf16 %v459_v46, %v459_v46 }
 0x431   : > { %v461_v47 = vpop.f32.mrf.mxu2 }
 0x432   : > { %v1445_v47 = vld [vmem:[%s2004_s8 + $0x38] sm:$0xff] }
 0x433   : > { %1097 = vmatpush.bf16.msrb.mxu1 %v1445_v47 }
 0x439   : > { %v516_v48 = vpop.f32.mrf.mxu2 }
 0x43a   : > { %v520_v49 = vpack.c.bf16 %v516_v48, %v516_v48  ;;  %v1469_v48 = vld [vmem:[%s2004_s8 + $0xf8] sm:$0xff] }
 0x43c   : > { %v636_v50 = vunpack.c.l.b16 %v520_v49 }
 0x43e   : > { %v637_v51 = vpack.c.b16 %v636_v50, %v636_v50  ;;  %v1453_v50 = vld [vmem:[%s2004_s8 + $0x78] sm:$0xff] }
 0x440   : > { %638 = vrot.lane.b32.xlu1 %v637_v51, %s1623_s21  ;;  %v1461_v51 = vld [vmem:[%s2004_s8 + $0xb8] sm:$0xff]  ;;  %s1230_s21 = sshll.u32 %s321_s17, 3 }
 0x441   : > { %v518_v52 = vpop.f32.mrf.mxu2  ;;  %1123 = vmatpush.bf16.msra.mxu2 %v1461_v51  ;;  %s323_s26 = scalar_lea.vmem [#allocation2], %s1230_s21 }
 0x442   : > { %v1444_v52 = vld [vmem:[%s2004_s8 + $0x30] sm:$0xff]  ;;  %s1164_s27 = sshll.u32 %s323_s26, 4  ;;  %s1165_s27 = int_to_ptr.vmem [resolvable:$true] %s1164_s27 }
 0x443   : > { %1098 = vmatpush.bf16.msrb.mxu1 %v1444_v52 }
 0x449   : > { %v573_v53 = vpop.f32.mrf.mxu1  ;;  %v630_v54 = vpop.f32.mrf.mxu2 }
 0x44a   : > { %v577_v55 = vpack.c.bf16 %v573_v53, %v573_v53  ;;  %v634_v56 = vpack.c.bf16 %v630_v54, %v630_v54  ;;  %v1468_v53 = vld [vmem:[%s2004_s8 + $0xf0] sm:$0xff] }
 0x44c   : > { %v641_v57 = vunpack.c.l.b16 %v577_v55  ;;  %v646_v58 = vunpack.c.l.b16 %v634_v56  ;;  %v1460_v55 = vld [vmem:[%s2004_s8 + $0xb0] sm:$0xff]  ;;  %v1443_v56 = vld [vmem:[%s2004_s8 + $0x28] sm:$0xff] }
 0x44d   : > { %1124 = vmatpush.bf16.msra.mxu2 %v1460_v55  ;;  %1099 = vmatpush.bf16.msrb.mxu1 %v1443_v56 }
 0x44e   : > { %v642_v59 = vpack.c.b16 %v641_v57, %v641_v57  ;;  %v647_v60 = vpack.c.b16 %v646_v58, %v646_v58  ;;  %v1467_v57 = vld [vmem:[%s2004_s8 + $0xe8] sm:$0xff] }
 0x44f   : > { %v1451_v58 = vld [vmem:[%s2004_s8 + $0x68] sm:$0xff] }
 0x450   : > { %648 = vrot.lane.b32.xlu0 %v647_v60, %s1624_s22  ;;  %643 = vrot.lane.b32.xlu2 %v642_v59, %s1625_s23  ;;  %v1459_v59 = vld [vmem:[%s2004_s8 + $0xa8] sm:$0xff]  ;;  %v1442_v60 = vld [vmem:[%s2004_s8 + $0x20] sm:$0xff]  ;;  %s1423_s22 = sshll.u32 %s1697_s13, 3  ;;  %s1152_s13 = scalar_lea.sflag [#allocation3], %s321_s17 }
 0x451   : > { %v575_v61 = vpop.f32.mrf.mxu1  ;;  %v632_v62 = vpop.f32.mrf.mxu2  ;;  %1125 = vmatpush.bf16.msra.mxu2 %v1459_v59  ;;  %1100 = vmatpush.bf16.msrb.mxu1 %v1442_v60  ;;  %s1162_s25 = scalar_lea.hbm %s2005_s9, %s1423_s22  ;;  %s1567_s22 = scalar_lea.hbm %s2005_s9, 16 }
 0x452   : > { %v1466_v61 = vld [vmem:[%s2004_s8 + $0xe0] sm:$0xff]  ;;  %s1166_s28 = sshll.u32 %s1162_s25, 4  ;;  %s1167_s28 = int_to_ptr.hbm [resolvable:$true] %s1166_s28 }
 0x453   : > { %s1561_s29 = sshra.s32 %s1167_s28, 4  ;;  %s1562_s29 = int_to_ptr.hbm [resolvable:$true] %s1561_s29 }
 0x454   : > { %s1563_s14 = scalar_lea.hbm %s1562_s29, 8  ;;  %p1568_p0 = scmp.lt.s32.totalorder %s1562_s29, %s2005_s9 }
 0x455   : > { %1126 = vmatpush.bf16.msra.mxu2 %v1458_v1  ;;  %p1564_p11 = scmp.ne.s32.totalorder %s1562_s29, %s1563_s14  ;;  %p1569_p1 = scmp.lt.s32.totalorder %s1567_s22, %s1563_s14 }
 0x457   : > { %p1565_p12 = pnand %p1564_p11, %p1714_p5  ;;  %p1570_p2 = por %p1569_p1, %p1568_p0 }
 0x459   : > { %p1566_p13 = pneg %p1565_p12 }
 0x45b   : > { %p1571_p3 = pnand %p1570_p2, %p1566_p13 }
 0x4aa   : > { %v644_v5 = vpop.permute.xlu2 %643 }
 0x4b2   : > { %v639_v2 = vpop.permute.xlu1 %638 }
 0x4b3   : > { %v652_v4 = vsel %vm409_vm5, %v463_v3, %v639_v2 }
 0x4b4   : > { %v655_v7 = vsel %vm653_vm7, %v652_v4, %v644_v5  ;;  %v1441_v4 = vld [vmem:[%s2004_s8 + $0x18] sm:$0xff] }
 0x4b5   : > { %v1465_v5 = vld [vmem:[%s2004_s8 + $0xd8] sm:$0xff]  ;;  %1101 = vmatpush.bf16.msrb.mxu1 %v1441_v4 }
 0x4c2   : > { %v649_v6 = vpop.permute.xlu0 %648 }
 0x4c3   : > { %v658_v9 = vsel %vm656_vm8, %v655_v7, %v649_v6  ;;  %v1449_v6 = vld [vmem:[%s2004_s8 + $0x58] sm:$0xff] }
 0x4c4   : > { %1257 = vmatmul.msk.bf16.vlgmr.msra.gmra.mxu0 %vm332_vm0, %v658_v9  ;;  %v1457_v7 = vld [vmem:[%s2004_s8 + $0x98] sm:$0xff] }
 0x4c5   : > { %1136 = vmatpush.bf16.msra.mxu0 %v1469_v48  ;;  %1127 = vmatpush.bf16.msra.mxu2 %v1457_v7 }
 0x4c9   : > { %1137 = vmatpush.bf16.msra.mxu0 %v1468_v53 }
 0x4cd   : > { %1138 = vmatpush.bf16.msra.mxu0 %v1467_v57 }
 0x4d1   : > { %1139 = vmatpush.bf16.msra.mxu0 %v1466_v61 }
 0x4d5   : > { %1140 = vmatpush.bf16.msra.mxu0 %v1465_v5 }
 0x541   : > { %v687_v12 = vpop.f32.mrf.mxu0 }
 0x542   : > { %v688_v13 = vadd.f32 %v687_v12, %v663_v11  ;;  %v1440_v12 = vld [vmem:[%s2004_s8 + $0x10] sm:$0xff] }
 0x543   : > { %1102 = vmatpush.bf16.msrb.mxu1 %v1440_v12 }
 0x544   : > { %v1795_v14 = vadd.f32 %v688_v13, %v1729_v0  ;;  %v1434_v0 = vld [vmem:[%s2002_s6 + $0x24] sm:$0xf]  ;;  %v1464_v13 = vld [vmem:[%s2004_s8 + $0xd0] sm:$0xff] }
 0x545   : > { %v1281_v25 = vor.u32 %v1434_v0, %v1278_v22  ;;  %1141 = vmatpush.bf16.msra.mxu0 %v1464_v13 }
 0x546   : > { %v692_v15 = vsel %vm332_vm0, %v1795_v14, 0.0 }
 0x547   : > { %693 = vadd.xlane.f32.xlu2 %v692_v15  ;;  %799 = vmatpush.bf16.msra.mxu3 %v1281_v25  ;;  %v1456_v25 = vld [vmem:[%s2004_s8 + $0x90] sm:$0xff] }
 0x548   : > { %1103 = vmatpush.bf16.msrb.mxu1 %v1439_v23  ;;  %1128 = vmatpush.bf16.msra.mxu2 %v1456_v25 }
 0x549   : > { %v689_v16 = vpop.f32.mrf.mxu0 }
 0x54a   : > { %v714_v16 = vperm.slane %v1748_v24, 2 }
 0x54b   : > { %800 = vmatpush.bf16.msra.mxu3 %v1265_v37 }
 0x54c   : > { %1104 = vmatpush.bf16.msrb.mxu1 %v1438_v26  ;;  %1129 = vmatpush.bf16.msra.mxu2 %v1455_v29 }
 0x54f   : > { %1110 = vmatpush.bf16.msrb.mxu3 %v1453_v50 }
 0x550   : > { %1130 = vmatpush.bf16.msra.mxu2 %v1454_v31 }
 0x5ba   : > { %v694_v17 = vpop.xlane.xlu2 %693 }
 0x5bb   : > { %v695_v18 = vmul.f32 %v694_v17, %v1733_v8 }
 0x5bd   : > { %v1801_v19 = vsub.f32 %v1795_v14, %v695_v18 }
 0x5bf   : > { %v697_v20 = vmul.f32 %v1801_v19, %v1801_v19 }
 0x5c1   : > { %v698_v21 = vsel %vm332_vm0, %v697_v20, 0.0  ;;  %v716_v20 = vperm.slane %v1748_v24, 3  ;;  %v1448_v24 = vld [vmem:[%s2004_s8 + $0x50] sm:$0xff] }
 0x5c2   : > { %699 = vadd.xlane.f32.xlu0 %v698_v21 }
 0x635   : > { %v700_v46 = vpop.xlane.xlu0 %699 }
 0x636   : > { %v701_v49 = vmul.f32 %v700_v46, %v1733_v8  ;;  %v1452_v8 = vld [vmem:[%s2004_s8 + $0x70] sm:$0xff] }
 0x637   : > { %1111 = vmatpush.bf16.msrb.mxu3 %v1452_v8 }
 0x638   : > { %v702_v54 = vadd.f32 1e-06, %v701_v49 }
 0x63a   : > { %1545 = vrsqrt.f32 %v702_v54  ;;  %vm709_vm10 = vweird.f32 %v702_v54 }
 0x63b   : > { %1112 = vmatpush.bf16.msrb.mxu3 %v1451_v58  ;;  %v904_v58 = vperm.slane %v1791_v10, 1 }
 0x63f   : > { %1113 = vmatpush.bf16.msrb.mxu3 %v1450_v63 }
 0x640   : > { %v1546_v62 = vpop.eup %1545 }
 0x641   : > { %v704_v2 = vmul.f32 %v1546_v62, %v702_v54  ;;  %vm710_vm9 = vweird.f32 %v1546_v62 }
 0x642   : > { %vm711_vm11 = vmor %vm709_vm10, %vm710_vm9 }
 0x643   : > { %v705_v3 = vmul.f32 %v1546_v62, %v704_v2  ;;  %1114 = vmatpush.bf16.msrb.mxu3 %v1449_v6 }
 0x645   : > { %v706_v9 = vmul.f32 0.5, %v705_v3 }
 0x647   : > { %v707_v11 = vsub.f32 1.5, %v706_v9  ;;  %1115 = vmatpush.bf16.msrb.mxu3 %v1448_v24 }
 0x649   : > { %v708_v15 = vmul.f32 %v1546_v62, %v707_v11 }
 0x64b   : > { %v712_v17 = vsel %vm711_vm11, %v1546_v62, %v708_v15  ;;  %1116 = vmatpush.bf16.msrb.mxu3 %v1447_v28 }
 0x64c   : > { %v713_v18 = vmul.f32 %v712_v17, %v1801_v19  ;;  %v1463_v19 = vld [vmem:[%s2004_s8 + $0xc8] sm:$0xff] }
 0x64d   : > { %1142 = vmatpush.bf16.msra.mxu0 %v1463_v19 }
 0x64e   : > { %v715_v21 = vmul.f32 %v714_v16, %v713_v18 }
 0x64f   : > { %1117 = vmatpush.bf16.msrb.mxu3 %v1446_v30 }
 0x650   : > { %v717_v0 = vadd.f32 %v716_v20, %v715_v21 }
 0x651   : > { %1143 = vmatpush.bf16.msra.mxu0 %v1462_v27 }
 0x652   : > { %v718_v22 = vpack.c.bf16 %v717_v0, %v717_v0 }
 0x654   : > { %1290 = vmatmul.msk.bf16.vlgmr.msra.gmra.mxu1 %vm332_vm0, %v718_v22  ;;  %1291 = vmatmul.msk.bf16.vlgmr.msra.gmra.mxu3 %vm332_vm0, %v718_v22 }
 0x655   : > { %1292 = vmatmul.msk.bf16.vlgmr.msrb.gmra.mxu2 %vm332_vm0, %v718_v22  ;;  %1293 = vmatmul.msk.bf16.vlgmr.msrb.gmra.mxu0 %vm332_vm0, %v718_v22 }
 0x6d1   : > { %v789_v35 = vpop.f32.mrf.mxu1 }
 0x6d2   : > { %v790_v36 = vadd.f32 %v789_v35, %v729_v33  ;;  %v828_v37 = vpop.f32.mrf.mxu0 }
 0x6d3   : > { %v829_v38 = vadd.f32 %v828_v37, %v732_v34 }
 0x6d4   : > { %v832_v39 = vmax.f32 %v790_v36, 0.0 }
 0x6d5   : > { %v835_v41 = vmax.f32 %v829_v38, 0.0 }
 0x6d6   : > { %v836_v43 = vpack.c.bf16 %v832_v39, %v832_v39 }
 0x6d7   : > { %v839_v44 = vpack.c.bf16 %v835_v41, %v835_v41  ;;  %v802_v45 = vpop.f32.mrf.mxu3 }
 0x6d8   : > { %v803_v46 = vadd.f32 %v802_v45, %v730_v40  ;;  %v815_v47 = vpop.f32.mrf.mxu2  ;;  %1105 = vmatmul.bf16.vlgmr.msrb.gmra.mxu1 %v836_v43 }
 0x6d9   : > { %v816_v48 = vadd.f32 %v815_v47, %v731_v42  ;;  %1144 = vmatmul.bf16.vlgmr.msra.gmra.mxu0 %v839_v44  ;;  %v791_v49 = vpop.f32.mrf.mxu1 }
 0x6da   : > { %v833_v50 = vmax.f32 %v803_v46, 0.0  ;;  %v830_v51 = vpop.f32.mrf.mxu0 }
 0x6db   : > { %v834_v52 = vmax.f32 %v816_v48, 0.0 }
 0x6dc   : > { %v837_v53 = vpack.c.bf16 %v833_v50, %v833_v50 }
 0x6dd   : > { %v838_v54 = vpack.c.bf16 %v834_v52, %v834_v52 }
 0x6de   : > { %1118 = vmatmul.bf16.vlgmr.msrb.gmra.mxu3 %v837_v53 }
 0x6df   : > { %1131 = vmatmul.bf16.vlgmr.msra.gmra.mxu2 %v838_v54  ;;  %v804_v8 = vpop.f32.mrf.mxu3 }
 0x6e0   : > { %v817_v55 = vpop.f32.mrf.mxu2 }
 0x755   : > { %v1106_v56 = vpop.f32.mrf.mxu1 }
 0x756   : > { %v1145_v57 = vpop.f32.mrf.mxu0  ;;  %v1107_v61 = vadd.f32 %v1106_v56, %v904_v58 }
 0x75d   : > { %v1108_v59 = vpop.f32.mrf.mxu1 }
 0x75e   : > { %v1147_v60 = vpop.f32.mrf.mxu0 }
 0x761   : > { %v1119_v62 = vpop.f32.mrf.mxu3 }
 0x762   : > { %v1120_v63 = vadd.f32 %v1119_v62, %v1107_v61  ;;  %v1132_v1 = vpop.f32.mrf.mxu2 }
 0x764   : > { %v1133_v2 = vadd.f32 %v1132_v1, %v1120_v63 }
 0x766   : > { %v1146_v3 = vadd.f32 %v1145_v57, %v1133_v2 }
 0x768   : > { %v1149_v10 = vadd.f32 %v1146_v3, %v1795_v14 }
 0x769   : > { %v1121_v4 = vpop.f32.mrf.mxu3 }
 0x76a   : > { %v1134_v5 = vpop.f32.mrf.mxu2  ;;  %1150 = vst.msk [vmem:[%s323_s26] sm:$0xff] %vm332_vm0, %v1149_v10 }
 0x76b   : > { %1574 = shalt.err (!%p1571_p3)
}
 0x76c   : > { %1470 = dma.vmem_to_hbm [thread:$0]  (%p1714_p5), %s1165_s27, 128, %s1167_s28, %s1152_s13  }
 0x76d PF: > { %p1476_p4 = scmp.ge.s32.totalorder %s1609_s12, 2  ;;  %s1178_s17 = sand.u32 1, %s1597_s30  }
 0x76e   : > { %s1179_s25 = scalar_lea.sflag [#allocation3], %s1178_s17 }
 0x76f   : > { %p1473_p7 = pnand %p1476_p4, %p1718_p6 }
 0x771   : > { %p1474_p8 = pneg %p1473_p7 }
 0x773   : > { %1592 = dma.done.wait (%p1474_p8), %s1179_s25, 128  }
 0x774   : > { %1594 = vsyncadd (%p1474_p8), %s1179_s25, 4294967168  ;;  %p19_p9 = scmp.ge.s32.totalorder %s1701_s15, 4   ;;  %s2008_s30 = smov %s1601_s10 }
 0x775   : > { %s2009_s10 = smov %s1605_s11  ;;  %s2010_s11 = smov %s1712_s18 }
 0x776   : > { %s2011_s12 = smov %s1701_s15  ;;  %21 = sbr.rel (!%p19_p9) target bundleno = 3 (0x3), region = 91 }
 0x77b   :  { %1185 = vsyncpa [#allocation3], 1 }
 0x77c   :  { %1187 = vsyncpa [#allocation3 + $0x1], 1 }

</bundles_post_ra>
